<compile_context>
chip_gen: v6e
topology: v6e:2x2x1
jax: 0.10.0
libtpu: 0.0.40
codegen_flags: <defaults>
</compile_context>

<pallas_src>
import jax
import jax.numpy as jnp
from jax import lax
from jax.experimental import pallas as pl
from jax.experimental.pallas import tpu as pltpu

LANE = 128
SUBLANE = 8


def _round_up(x, m):
    return (x + m - 1) // m * m


# ----------------------------------------------------------------------------
# Parameter packing (done once, outside the per-call path).
# Everything the kernel needs is packed, already transposed, into one
# (rows, 128) f32 slab that stays VMEM-resident across the batch grid.
# ----------------------------------------------------------------------------
def pack_params(p):
    V, E = p["emb_table"].shape
    Dq, Eq = p["w1"].shape
    F = Eq + E
    F2 = p["wo1"].shape[1]
    E1 = E + 1
    assert p["wo1"].shape[0] == F
    assert max(Dq, Eq, E1, V, F2) <= LANE, "slab packing assumes widths <= 128"

    f32 = jnp.float32
    emb = p["emb_table"].astype(f32)                                    # (V, E)
    # Fused gather column (exact, precomputed in f32): the qualitative
    # attention MLP only depends on the token's embedding row.
    score_col = jnp.tanh(emb @ p["wa"].astype(f32)
                         + p["ba"].astype(f32)) @ p["va"].astype(f32)   # (V,)
    emb_aug_t = jnp.concatenate([emb, score_col[:, None]], axis=1).T    # (E+1, V)

    offs = {}
    total = 0

    def alloc(name, n_rows):
        nonlocal total
        offs[name] = total
        total += _round_up(n_rows, SUBLANE)

    alloc("w1t", Eq)      # (Eq, Dq)  = w1^T
    alloc("wo1qt", F2)    # (F2, Eq)  = wo1[:Eq]^T  (quant rows of fused head)
    alloc("wo1ct", F2)    # (F2, E)   = wo1[Eq:]^T  (qual rows of fused head)
    alloc("embt", E1)     # (E+1, V)  = [emb | score]^T
    alloc("b1", Eq)       # column vectors: broadcast along the batch/lane axis
    alloc("gamma", Eq)
    alloc("beta", Eq)
    alloc("bo1", F2)
    alloc("wo2", F2)
    alloc("bo2", 1)

    slab = jnp.zeros((_round_up(total, SUBLANE), LANE), f32)

    def put_mat(s, name, mat):
        m = jnp.asarray(mat, f32)
        r = offs[name]
        return s.at[r:r + m.shape[0], :m.shape[1]].set(m)

    def put_col(s, name, vec):
        v = jnp.asarray(vec, f32).reshape(-1, 1)
        r = offs[name]
        return s.at[r:r + v.shape[0], 0:1].set(v)

    wo1 = p["wo1"].astype(f32)                         # (F, F2)
    slab = put_mat(slab, "w1t", p["w1"].astype(f32).T)
    slab = put_mat(slab, "wo1qt", wo1[:Eq, :].T)
    slab = put_mat(slab, "wo1ct", wo1[Eq:, :].T)
    slab = put_mat(slab, "embt", emb_aug_t)
    slab = put_col(slab, "b1", p["b1"])
    slab = put_col(slab, "gamma", p["gamma"])
    slab = put_col(slab, "beta", p["beta"])
    slab = put_col(slab, "bo1", p["bo1"])
    slab = put_col(slab, "wo2", p["wo2"])
    slab = put_col(slab, "bo2", p["bo2"])

    dims = dict(Dq=Dq, Eq=Eq, E=E, V=V, F2=F2, offs=offs)
    return dict(wslab=slab, dims=dims)


# ----------------------------------------------------------------------------
# Kernel (transposed layout: features on sublanes, batch on lanes)
# ----------------------------------------------------------------------------
def _build_kernel(dims, S):
    Dq, Eq, E, V, F2 = dims["Dq"], dims["Eq"], dims["E"], dims["V"], dims["F2"]
    E1 = E + 1
    o = dims["offs"]

    def kernel(xqT_ref, idxT_ref, w_ref, outT_ref):
        f32 = jnp.float32
        TB = xqT_ref.shape[1]

        # --- static, sublane-aligned slices of the resident parameter slab ---
        w1t = w_ref[o["w1t"]:o["w1t"] + Eq, :Dq]           # (Eq, Dq)
        wo1qt = w_ref[o["wo1qt"]:o["wo1qt"] + F2, :Eq]     # (F2, Eq)
        wo1ct = w_ref[o["wo1ct"]:o["wo1ct"] + F2, :E]      # (F2, E)
        embt = w_ref[o["embt"]:o["embt"] + E1, :V]         # (E+1, V)
        b1 = w_ref[o["b1"]:o["b1"] + Eq, 0:1]              # (Eq, 1)
        gamma = w_ref[o["gamma"]:o["gamma"] + Eq, 0:1]
        beta = w_ref[o["beta"]:o["beta"] + Eq, 0:1]
        bo1 = w_ref[o["bo1"]:o["bo1"] + F2, 0:1]           # (F2, 1)
        wo2 = w_ref[o["wo2"]:o["wo2"] + F2, 0:1]           # (F2, 1)
        bo2 = w_ref[o["bo2"]:o["bo2"] + 1, 0:1]            # (1, 1)

        # --- quantitative stream: Linear -> ReLU -> LayerNorm -----------------
        q = jnp.dot(w1t, xqT_ref[...], preferred_element_type=f32) + b1  # (Eq, TB)
        q = jnp.maximum(q, 0.0)
        mu = jnp.mean(q, axis=0, keepdims=True)                          # (1, TB)
        var = jnp.mean(q * q, axis=0, keepdims=True) - mu * mu           # one-pass
        qn = (q - mu) * lax.rsqrt(var + 1e-5) * gamma + beta             # (Eq, TB)

        # --- qualitative stream: fused gather + online softmax ----------------
        idx = idxT_ref[...]                                              # (S, TB)
        iota_v = lax.broadcasted_iota(jnp.int32, (V, TB), 0)

        def gather(s):
            onehot = (iota_v == idx[s:s + 1, :]).astype(f32)             # (V, TB)
            ge = jnp.dot(embt, onehot, preferred_element_type=f32)       # (E+1, TB)
            return ge[:E, :], ge[E:E + 1, :]                             # qe, score

        acc, m = gather(0)                                               # (E,TB),(1,TB)
        denom = jnp.ones_like(m)
        for s in range(1, S):        # unrolled; S is small for this probe
            qe_s, sc = gather(s)
            m_new = jnp.maximum(m, sc)
            alpha = jnp.exp(m - m_new)
            p_s = jnp.exp(sc - m_new)
            denom = denom * alpha + p_s
            acc = acc * alpha + p_s * qe_s
            m = m_new
        ctx = acc / denom                                                # (E, TB)

        # --- fused output head: Linear -> ReLU -> (Dropout=id) -> Linear ------
        # concat([qn, ctx]) @ wo1 expressed as two dots on the transposed,
        # row-split wo1 slab (identical math).
        z = (jnp.dot(wo1qt, qn, preferred_element_type=f32)
             + jnp.dot(wo1ct, ctx, preferred_element_type=f32) + bo1)    # (F2, TB)
        h1 = jnp.maximum(z, 0.0)
        # final F2 -> 1 contraction on VPU + sublane reduce; output stays
        # lane-dense (batch on the lane axis).
        outT_ref[...] = jnp.sum(h1 * wo2, axis=0, keepdims=True) + bo2   # (1, TB)

    return kernel


# ----------------------------------------------------------------------------
# Wrapper: batch streams over the lane axis, resident weights, parallel grid
# ----------------------------------------------------------------------------
def _choose_tiles(B, block_b):
    # Small batch: single grid step, blocks equal the (8-padded) full dims.
    if B <= min(block_b, 128):
        tb = _round_up(max(B, 1), SUBLANE)
        return tb, tb, 1
    # Tiled: lane-axis blocks must be multiples of 128; aim for >= 2 grid
    # steps so a v7x megacore can split the batch across its TensorCores.
    half = _round_up(-(-B // 2), LANE)
    tb = max(LANE, min(_round_up(block_b, LANE), half))
    padded = _round_up(B, tb)
    return tb, padded, padded // tb


def dual_stream_probe(x_quant, x_qual, packed, *, block_b=512):
    wslab, dims = packed["wslab"], packed["dims"]
    B, Dq = x_quant.shape
    S = x_qual.shape[1]
    assert Dq == dims["Dq"]

    TB, padded_B, nb = _choose_tiles(B, block_b)

    # Transposed, lane-dense layouts: batch on the (fast) lane axis everywhere.
    # (Wrapper-side transpose/pad is layout plumbing on tiny arrays.)
    xqT = x_quant.astype(jnp.float32).T            # (Dq, B)
    idxT = x_qual.astype(jnp.int32).T              # (S, B)
    if padded_B != B:
        pad = padded_B - B
        xqT = jnp.pad(xqT, ((0, 0), (0, pad)))
        idxT = jnp.pad(idxT, ((0, 0), (0, pad)))

    kernel = _build_kernel(dims, S)

    outT = pl.pallas_call(
        kernel,
        out_shape=jax.ShapeDtypeStruct((1, padded_B), jnp.float32),
        grid_spec=pltpu.PrefetchScalarGridSpec(
            num_scalar_prefetch=0,
            grid=(nb,),
            in_specs=[
                pl.BlockSpec((Dq, TB), lambda i: (0, i)),    # streams over batch
                pl.BlockSpec((S, TB), lambda i: (0, i)),     # dense token ids
                pl.BlockSpec(wslab.shape, lambda i: (0, 0)),  # resident weights
            ],
            out_specs=pl.BlockSpec((1, TB), lambda i: (0, i)),  # lane-dense out
        ),
        compiler_params=pltpu.CompilerParams(
            dimension_semantics=("parallel",),
            vmem_limit_bytes=32 * 1024 * 1024),
    )(xqT, idxT, wslab)

    return outT[0, :B].reshape(B, 1)


# ----------------------------------------------------------------------------
# Deterministic parameter construction (shapes per the PyTorch module)
# ----------------------------------------------------------------------------
def make_params(quant_input_size, vocab_size,
                qual_embed_dim=16, quant_embed_dim=48, attention_dim=16):
    fused = quant_embed_dim + qual_embed_dim
    keys = jax.random.split(jax.random.PRNGKey(42), 10)
    s = 0.1
    n = lambda k, shp: (s * jax.random.normal(k, shp)).astype(jnp.float32)
    return {
        "emb_table": n(keys[0], (vocab_size, qual_embed_dim)),
        # quant_embed: Linear(Dq, Eq) + ReLU + LayerNorm(Eq)
        "w1": n(keys[1], (quant_input_size, quant_embed_dim)),
        "b1": n(keys[2], (quant_embed_dim,)),
        "gamma": jnp.ones((quant_embed_dim,), jnp.float32),
        "beta": jnp.zeros((quant_embed_dim,), jnp.float32),
        # qual_attention: Linear(E, A) + Tanh + Linear(A, 1, bias=False)
        "wa": n(keys[3], (qual_embed_dim, attention_dim)),
        "ba": n(keys[4], (attention_dim,)),
        "va": n(keys[5], (attention_dim,)),
        # output head: Linear(F, 2F) -> ReLU -> Dropout -> Linear(2F, 1)
        "wo1": n(keys[6], (fused, fused * 2)),
        "bo1": n(keys[7], (fused * 2,)),
        "wo2": n(keys[8], (fused * 2,)),
        "bo2": n(keys[9], (1,)),
    }


# ----------------------------------------------------------------------------
# Pure-JAX reference (mirrors the PyTorch forward, eval mode)
# ----------------------------------------------------------------------------
def reference(x_quant, x_qual, p):
    q = jnp.maximum(x_quant @ p["w1"] + p["b1"], 0.0)
    mu = jnp.mean(q, axis=-1, keepdims=True)
    var = jnp.mean((q - mu) ** 2, axis=-1, keepdims=True)
    qn = (q - mu) / jnp.sqrt(var + 1e-5) * p["gamma"] + p["beta"]

    qe = p["emb_table"][x_qual]                          # (B, S, E)
    h = jnp.tanh(qe @ p["wa"] + p["ba"])                 # (B, S, A)
    scores = h @ p["va"]                                 # (B, S)
    attn = jax.nn.softmax(scores, axis=1)
    ctx = jnp.einsum("bs,bse->be", attn, qe)

    fused = jnp.concatenate([qn, ctx], axis=1)
    h1 = jnp.maximum(fused @ p["wo1"] + p["bo1"], 0.0)
    return (h1 @ p["wo2"])[:, None] + p["bo2"]


if __name__ == "__main__":
    B = 8
    quant_input_size = 32
    vocab_size = 50
    seq = 8

    key = jax.random.PRNGKey(0)
    k1, k2 = jax.random.split(key)
    x_quant = jax.random.normal(k1, (B, quant_input_size), dtype=jnp.float32)
    x_qual = jax.random.randint(k2, (B, seq), 0, vocab_size, dtype=jnp.int32)

    params = make_params(quant_input_size, vocab_size)
    packed = pack_params(params)

    out = dual_stream_probe(x_quant, x_qual, packed)
    out = jax.block_until_ready(out)

    ref = reference(x_quant, x_qual, params)
    assert out.shape == (B, 1)
    err = float(jnp.max(jnp.abs(out - ref)))
    assert jnp.allclose(out, ref, atol=2e-4, rtol=2e-4), err

    print("KERNEL_OK")
</pallas_src>

<mosaic_0001>
module attributes {stable_mosaic.version = 11 : i64} {
  func.func @kernel(%arg0: i32, %arg1: memref<32x8xf32, #tpu.memory_space<vmem>>, %arg2: memref<8x8xi32, #tpu.memory_space<vmem>>, %arg3: memref<736x128xf32, #tpu.memory_space<vmem>>, %arg4: memref<1x8xf32, #tpu.memory_space<vmem>>) attributes {dimension_semantics = [#tpu.dimension_semantics<parallel>], iteration_bounds = array<i64: 1>, scalar_prefetch = 0 : i64, scratch_operands = 0 : i64, tpu.core_type = #tpu.core_type<tc>, window_params = [{transform_indices = @transform_0, window_bounds = array<i64: 32, 8>}, {transform_indices = @transform_1, window_bounds = array<i64: 8, 8>}, {pipeline_mode = #tpu.pipeline_mode<synchronous>, transform_indices = @transform_2, window_bounds = array<i64: 736, 128>}, {transform_indices = @transform_3, window_bounds = array<i64: 1, 8>}]} {
    %c0 = arith.constant 0 : index
    %c0_0 = arith.constant 0 : index
    %0 = vector.load %arg3[%c0, %c0_0] : memref<736x128xf32, #tpu.memory_space<vmem>>, vector<48x32xf32>
    %c48 = arith.constant 48 : index
    %c0_1 = arith.constant 0 : index
    %1 = vector.load %arg3[%c48, %c0_1] : memref<736x128xf32, #tpu.memory_space<vmem>>, vector<128x48xf32>
    %c176 = arith.constant 176 : index
    %c0_2 = arith.constant 0 : index
    %2 = vector.load %arg3[%c176, %c0_2] : memref<736x128xf32, #tpu.memory_space<vmem>>, vector<128x16xf32>
    %c304 = arith.constant 304 : index
    %c0_3 = arith.constant 0 : index
    %3 = vector.load %arg3[%c304, %c0_3] : memref<736x128xf32, #tpu.memory_space<vmem>>, vector<17x50xf32>
    %c328 = arith.constant 328 : index
    %c0_4 = arith.constant 0 : index
    %4 = vector.load %arg3[%c328, %c0_4] : memref<736x128xf32, #tpu.memory_space<vmem>>, vector<48x1xf32>
    %c376 = arith.constant 376 : index
    %c0_5 = arith.constant 0 : index
    %5 = vector.load %arg3[%c376, %c0_5] : memref<736x128xf32, #tpu.memory_space<vmem>>, vector<48x1xf32>
    %c424 = arith.constant 424 : index
    %c0_6 = arith.constant 0 : index
    %6 = vector.load %arg3[%c424, %c0_6] : memref<736x128xf32, #tpu.memory_space<vmem>>, vector<48x1xf32>
    %c472 = arith.constant 472 : index
    %c0_7 = arith.constant 0 : index
    %7 = vector.load %arg3[%c472, %c0_7] : memref<736x128xf32, #tpu.memory_space<vmem>>, vector<128x1xf32>
    %c600 = arith.constant 600 : index
    %c0_8 = arith.constant 0 : index
    %8 = vector.load %arg3[%c600, %c0_8] : memref<736x128xf32, #tpu.memory_space<vmem>>, vector<128x1xf32>
    %c728 = arith.constant 728 : index
    %c0_9 = arith.constant 0 : index
    %9 = vector.load %arg3[%c728, %c0_9] : memref<736x128xf32, #tpu.memory_space<vmem>>, vector<1x1xf32>
    %c0_10 = arith.constant 0 : index
    %c0_11 = arith.constant 0 : index
    %10 = vector.load %arg1[%c0_10, %c0_11] : memref<32x8xf32, #tpu.memory_space<vmem>>, vector<32x8xf32>
    %cst = arith.constant dense<0.000000e+00> : vector<48x8xf32>
    %11 = tpu.matmul %0, %10, %cst {dimension_numbers = #tpu.dot_dimension_numbers<[1], [0], [0], [1], [0, 0, 1, 1], [], []>} : vector<48x32xf32>, vector<32x8xf32>, vector<48x8xf32> -> vector<48x8xf32>
    %12 = vector.broadcast %4 : vector<48x1xf32> to vector<48x8xf32>
    %13 = arith.addf %11, %12 : vector<48x8xf32>
    %cst_12 = arith.constant 0.000000e+00 : f32
    %14 = vector.broadcast %cst_12 : f32 to vector<48x8xf32>
    %15 = arith.maximumf %13, %14 : vector<48x8xf32>
    %cst_13 = arith.constant dense<0.000000e+00> : vector<8xf32>
    %16 = vector.multi_reduction <add>, %15, %cst_13 [0] : vector<48x8xf32> to vector<8xf32>
    %17 = vector.shape_cast %16 : vector<8xf32> to vector<1x8xf32>
    %cst_14 = arith.constant 4.800000e+01 : f32
    %18 = vector.broadcast %cst_14 : f32 to vector<1x8xf32>
    %19 = arith.divf %17, %18 : vector<1x8xf32>
    %20 = arith.mulf %15, %15 : vector<48x8xf32>
    %cst_15 = arith.constant dense<0.000000e+00> : vector<8xf32>
    %21 = vector.multi_reduction <add>, %20, %cst_15 [0] : vector<48x8xf32> to vector<8xf32>
    %22 = vector.shape_cast %21 : vector<8xf32> to vector<1x8xf32>
    %cst_16 = arith.constant 4.800000e+01 : f32
    %23 = vector.broadcast %cst_16 : f32 to vector<1x8xf32>
    %24 = arith.divf %22, %23 : vector<1x8xf32>
    %25 = arith.mulf %19, %19 : vector<1x8xf32>
    %26 = arith.subf %24, %25 : vector<1x8xf32>
    %27 = vector.broadcast %19 : vector<1x8xf32> to vector<48x8xf32>
    %28 = arith.subf %15, %27 : vector<48x8xf32>
    %cst_17 = arith.constant 9.99999974E-6 : f32
    %29 = vector.broadcast %cst_17 : f32 to vector<1x8xf32>
    %30 = arith.addf %26, %29 : vector<1x8xf32>
    %31 = math.rsqrt %30 : vector<1x8xf32>
    %32 = vector.broadcast %31 : vector<1x8xf32> to vector<48x8xf32>
    %33 = arith.mulf %28, %32 : vector<48x8xf32>
    %34 = vector.broadcast %5 : vector<48x1xf32> to vector<48x8xf32>
    %35 = arith.mulf %33, %34 : vector<48x8xf32>
    %36 = vector.broadcast %6 : vector<48x1xf32> to vector<48x8xf32>
    %37 = arith.addf %35, %36 : vector<48x8xf32>
    %c0_18 = arith.constant 0 : index
    %c0_19 = arith.constant 0 : index
    %38 = vector.load %arg2[%c0_18, %c0_19] : memref<8x8xi32, #tpu.memory_space<vmem>>, vector<8x8xi32>
    %39 = tpu.iota {dimensions = array<i32: 0>} : vector<50x8xi32>
    %40 = vector.extract_strided_slice %38 {offsets = [0, 0], sizes = [1, 8], strides = [1, 1]} : vector<8x8xi32> to vector<1x8xi32>
    %41 = vector.broadcast %40 : vector<1x8xi32> to vector<50x8xi32>
    %42 = arith.cmpi eq, %39, %41 : vector<50x8xi32>
    %43 = arith.extui %42 : vector<50x8xi1> to vector<50x8xi32>
    %44 = arith.sitofp %43 : vector<50x8xi32> to vector<50x8xf32>
    %cst_20 = arith.constant dense<0.000000e+00> : vector<17x8xf32>
    %45 = tpu.matmul %3, %44, %cst_20 {dimension_numbers = #tpu.dot_dimension_numbers<[1], [0], [0], [1], [0, 0, 1, 1], [], []>} : vector<17x50xf32>, vector<50x8xf32>, vector<17x8xf32> -> vector<17x8xf32>
    %46 = vector.extract_strided_slice %45 {offsets = [0, 0], sizes = [16, 8], strides = [1, 1]} : vector<17x8xf32> to vector<16x8xf32>
    %47 = vector.extract_strided_slice %45 {offsets = [16, 0], sizes = [1, 8], strides = [1, 1]} : vector<17x8xf32> to vector<1x8xf32>
    %cst_21 = arith.constant 1.000000e+00 : f32
    %48 = vector.broadcast %cst_21 : f32 to vector<1x8xf32>
    %49 = vector.extract_strided_slice %38 {offsets = [1, 0], sizes = [1, 8], strides = [1, 1]} : vector<8x8xi32> to vector<1x8xi32>
    %50 = vector.broadcast %49 : vector<1x8xi32> to vector<50x8xi32>
    %51 = arith.cmpi eq, %39, %50 : vector<50x8xi32>
    %52 = arith.extui %51 : vector<50x8xi1> to vector<50x8xi32>
    %53 = arith.sitofp %52 : vector<50x8xi32> to vector<50x8xf32>
    %cst_22 = arith.constant dense<0.000000e+00> : vector<17x8xf32>
    %54 = tpu.matmul %3, %53, %cst_22 {dimension_numbers = #tpu.dot_dimension_numbers<[1], [0], [0], [1], [0, 0, 1, 1], [], []>} : vector<17x50xf32>, vector<50x8xf32>, vector<17x8xf32> -> vector<17x8xf32>
    %55 = vector.extract_strided_slice %54 {offsets = [0, 0], sizes = [16, 8], strides = [1, 1]} : vector<17x8xf32> to vector<16x8xf32>
    %56 = vector.extract_strided_slice %54 {offsets = [16, 0], sizes = [1, 8], strides = [1, 1]} : vector<17x8xf32> to vector<1x8xf32>
    %57 = arith.maximumf %47, %56 : vector<1x8xf32>
    %58 = arith.subf %47, %57 : vector<1x8xf32>
    %59 = math.exp %58 : vector<1x8xf32>
    %60 = arith.subf %56, %57 : vector<1x8xf32>
    %61 = math.exp %60 : vector<1x8xf32>
    %62 = arith.mulf %48, %59 : vector<1x8xf32>
    %63 = arith.addf %62, %61 : vector<1x8xf32>
    %64 = vector.broadcast %59 : vector<1x8xf32> to vector<16x8xf32>
    %65 = arith.mulf %46, %64 : vector<16x8xf32>
    %66 = vector.broadcast %61 : vector<1x8xf32> to vector<16x8xf32>
    %67 = arith.mulf %66, %55 : vector<16x8xf32>
    %68 = arith.addf %65, %67 : vector<16x8xf32>
    %69 = vector.extract_strided_slice %38 {offsets = [2, 0], sizes = [1, 8], strides = [1, 1]} : vector<8x8xi32> to vector<1x8xi32>
    %70 = vector.broadcast %69 : vector<1x8xi32> to vector<50x8xi32>
    %71 = arith.cmpi eq, %39, %70 : vector<50x8xi32>
    %72 = arith.extui %71 : vector<50x8xi1> to vector<50x8xi32>
    %73 = arith.sitofp %72 : vector<50x8xi32> to vector<50x8xf32>
    %cst_23 = arith.constant dense<0.000000e+00> : vector<17x8xf32>
    %74 = tpu.matmul %3, %73, %cst_23 {dimension_numbers = #tpu.dot_dimension_numbers<[1], [0], [0], [1], [0, 0, 1, 1], [], []>} : vector<17x50xf32>, vector<50x8xf32>, vector<17x8xf32> -> vector<17x8xf32>
    %75 = vector.extract_strided_slice %74 {offsets = [0, 0], sizes = [16, 8], strides = [1, 1]} : vector<17x8xf32> to vector<16x8xf32>
    %76 = vector.extract_strided_slice %74 {offsets = [16, 0], sizes = [1, 8], strides = [1, 1]} : vector<17x8xf32> to vector<1x8xf32>
    %77 = arith.maximumf %57, %76 : vector<1x8xf32>
    %78 = arith.subf %57, %77 : vector<1x8xf32>
    %79 = math.exp %78 : vector<1x8xf32>
    %80 = arith.subf %76, %77 : vector<1x8xf32>
    %81 = math.exp %80 : vector<1x8xf32>
    %82 = arith.mulf %63, %79 : vector<1x8xf32>
    %83 = arith.addf %82, %81 : vector<1x8xf32>
    %84 = vector.broadcast %79 : vector<1x8xf32> to vector<16x8xf32>
    %85 = arith.mulf %68, %84 : vector<16x8xf32>
    %86 = vector.broadcast %81 : vector<1x8xf32> to vector<16x8xf32>
    %87 = arith.mulf %86, %75 : vector<16x8xf32>
    %88 = arith.addf %85, %87 : vector<16x8xf32>
    %89 = vector.extract_strided_slice %38 {offsets = [3, 0], sizes = [1, 8], strides = [1, 1]} : vector<8x8xi32> to vector<1x8xi32>
    %90 = vector.broadcast %89 : vector<1x8xi32> to vector<50x8xi32>
    %91 = arith.cmpi eq, %39, %90 : vector<50x8xi32>
    %92 = arith.extui %91 : vector<50x8xi1> to vector<50x8xi32>
    %93 = arith.sitofp %92 : vector<50x8xi32> to vector<50x8xf32>
    %cst_24 = arith.constant dense<0.000000e+00> : vector<17x8xf32>
    %94 = tpu.matmul %3, %93, %cst_24 {dimension_numbers = #tpu.dot_dimension_numbers<[1], [0], [0], [1], [0, 0, 1, 1], [], []>} : vector<17x50xf32>, vector<50x8xf32>, vector<17x8xf32> -> vector<17x8xf32>
    %95 = vector.extract_strided_slice %94 {offsets = [0, 0], sizes = [16, 8], strides = [1, 1]} : vector<17x8xf32> to vector<16x8xf32>
    %96 = vector.extract_strided_slice %94 {offsets = [16, 0], sizes = [1, 8], strides = [1, 1]} : vector<17x8xf32> to vector<1x8xf32>
    %97 = arith.maximumf %77, %96 : vector<1x8xf32>
    %98 = arith.subf %77, %97 : vector<1x8xf32>
    %99 = math.exp %98 : vector<1x8xf32>
    %100 = arith.subf %96, %97 : vector<1x8xf32>
    %101 = math.exp %100 : vector<1x8xf32>
    %102 = arith.mulf %83, %99 : vector<1x8xf32>
    %103 = arith.addf %102, %101 : vector<1x8xf32>
    %104 = vector.broadcast %99 : vector<1x8xf32> to vector<16x8xf32>
    %105 = arith.mulf %88, %104 : vector<16x8xf32>
    %106 = vector.broadcast %101 : vector<1x8xf32> to vector<16x8xf32>
    %107 = arith.mulf %106, %95 : vector<16x8xf32>
    %108 = arith.addf %105, %107 : vector<16x8xf32>
    %109 = vector.extract_strided_slice %38 {offsets = [4, 0], sizes = [1, 8], strides = [1, 1]} : vector<8x8xi32> to vector<1x8xi32>
    %110 = vector.broadcast %109 : vector<1x8xi32> to vector<50x8xi32>
    %111 = arith.cmpi eq, %39, %110 : vector<50x8xi32>
    %112 = arith.extui %111 : vector<50x8xi1> to vector<50x8xi32>
    %113 = arith.sitofp %112 : vector<50x8xi32> to vector<50x8xf32>
    %cst_25 = arith.constant dense<0.000000e+00> : vector<17x8xf32>
    %114 = tpu.matmul %3, %113, %cst_25 {dimension_numbers = #tpu.dot_dimension_numbers<[1], [0], [0], [1], [0, 0, 1, 1], [], []>} : vector<17x50xf32>, vector<50x8xf32>, vector<17x8xf32> -> vector<17x8xf32>
    %115 = vector.extract_strided_slice %114 {offsets = [0, 0], sizes = [16, 8], strides = [1, 1]} : vector<17x8xf32> to vector<16x8xf32>
    %116 = vector.extract_strided_slice %114 {offsets = [16, 0], sizes = [1, 8], strides = [1, 1]} : vector<17x8xf32> to vector<1x8xf32>
    %117 = arith.maximumf %97, %116 : vector<1x8xf32>
    %118 = arith.subf %97, %117 : vector<1x8xf32>
    %119 = math.exp %118 : vector<1x8xf32>
    %120 = arith.subf %116, %117 : vector<1x8xf32>
    %121 = math.exp %120 : vector<1x8xf32>
    %122 = arith.mulf %103, %119 : vector<1x8xf32>
    %123 = arith.addf %122, %121 : vector<1x8xf32>
    %124 = vector.broadcast %119 : vector<1x8xf32> to vector<16x8xf32>
    %125 = arith.mulf %108, %124 : vector<16x8xf32>
    %126 = vector.broadcast %121 : vector<1x8xf32> to vector<16x8xf32>
    %127 = arith.mulf %126, %115 : vector<16x8xf32>
    %128 = arith.addf %125, %127 : vector<16x8xf32>
    %129 = vector.extract_strided_slice %38 {offsets = [5, 0], sizes = [1, 8], strides = [1, 1]} : vector<8x8xi32> to vector<1x8xi32>
    %130 = vector.broadcast %129 : vector<1x8xi32> to vector<50x8xi32>
    %131 = arith.cmpi eq, %39, %130 : vector<50x8xi32>
    %132 = arith.extui %131 : vector<50x8xi1> to vector<50x8xi32>
    %133 = arith.sitofp %132 : vector<50x8xi32> to vector<50x8xf32>
    %cst_26 = arith.constant dense<0.000000e+00> : vector<17x8xf32>
    %134 = tpu.matmul %3, %133, %cst_26 {dimension_numbers = #tpu.dot_dimension_numbers<[1], [0], [0], [1], [0, 0, 1, 1], [], []>} : vector<17x50xf32>, vector<50x8xf32>, vector<17x8xf32> -> vector<17x8xf32>
    %135 = vector.extract_strided_slice %134 {offsets = [0, 0], sizes = [16, 8], strides = [1, 1]} : vector<17x8xf32> to vector<16x8xf32>
    %136 = vector.extract_strided_slice %134 {offsets = [16, 0], sizes = [1, 8], strides = [1, 1]} : vector<17x8xf32> to vector<1x8xf32>
    %137 = arith.maximumf %117, %136 : vector<1x8xf32>
    %138 = arith.subf %117, %137 : vector<1x8xf32>
    %139 = math.exp %138 : vector<1x8xf32>
    %140 = arith.subf %136, %137 : vector<1x8xf32>
    %141 = math.exp %140 : vector<1x8xf32>
    %142 = arith.mulf %123, %139 : vector<1x8xf32>
    %143 = arith.addf %142, %141 : vector<1x8xf32>
    %144 = vector.broadcast %139 : vector<1x8xf32> to vector<16x8xf32>
    %145 = arith.mulf %128, %144 : vector<16x8xf32>
    %146 = vector.broadcast %141 : vector<1x8xf32> to vector<16x8xf32>
    %147 = arith.mulf %146, %135 : vector<16x8xf32>
    %148 = arith.addf %145, %147 : vector<16x8xf32>
    %149 = vector.extract_strided_slice %38 {offsets = [6, 0], sizes = [1, 8], strides = [1, 1]} : vector<8x8xi32> to vector<1x8xi32>
    %150 = vector.broadcast %149 : vector<1x8xi32> to vector<50x8xi32>
    %151 = arith.cmpi eq, %39, %150 : vector<50x8xi32>
    %152 = arith.extui %151 : vector<50x8xi1> to vector<50x8xi32>
    %153 = arith.sitofp %152 : vector<50x8xi32> to vector<50x8xf32>
    %cst_27 = arith.constant dense<0.000000e+00> : vector<17x8xf32>
    %154 = tpu.matmul %3, %153, %cst_27 {dimension_numbers = #tpu.dot_dimension_numbers<[1], [0], [0], [1], [0, 0, 1, 1], [], []>} : vector<17x50xf32>, vector<50x8xf32>, vector<17x8xf32> -> vector<17x8xf32>
    %155 = vector.extract_strided_slice %154 {offsets = [0, 0], sizes = [16, 8], strides = [1, 1]} : vector<17x8xf32> to vector<16x8xf32>
    %156 = vector.extract_strided_slice %154 {offsets = [16, 0], sizes = [1, 8], strides = [1, 1]} : vector<17x8xf32> to vector<1x8xf32>
    %157 = arith.maximumf %137, %156 : vector<1x8xf32>
    %158 = arith.subf %137, %157 : vector<1x8xf32>
    %159 = math.exp %158 : vector<1x8xf32>
    %160 = arith.subf %156, %157 : vector<1x8xf32>
    %161 = math.exp %160 : vector<1x8xf32>
    %162 = arith.mulf %143, %159 : vector<1x8xf32>
    %163 = arith.addf %162, %161 : vector<1x8xf32>
    %164 = vector.broadcast %159 : vector<1x8xf32> to vector<16x8xf32>
    %165 = arith.mulf %148, %164 : vector<16x8xf32>
    %166 = vector.broadcast %161 : vector<1x8xf32> to vector<16x8xf32>
    %167 = arith.mulf %166, %155 : vector<16x8xf32>
    %168 = arith.addf %165, %167 : vector<16x8xf32>
    %169 = vector.extract_strided_slice %38 {offsets = [7, 0], sizes = [1, 8], strides = [1, 1]} : vector<8x8xi32> to vector<1x8xi32>
    %170 = vector.broadcast %169 : vector<1x8xi32> to vector<50x8xi32>
    %171 = arith.cmpi eq, %39, %170 : vector<50x8xi32>
    %172 = arith.extui %171 : vector<50x8xi1> to vector<50x8xi32>
    %173 = arith.sitofp %172 : vector<50x8xi32> to vector<50x8xf32>
    %cst_28 = arith.constant dense<0.000000e+00> : vector<17x8xf32>
    %174 = tpu.matmul %3, %173, %cst_28 {dimension_numbers = #tpu.dot_dimension_numbers<[1], [0], [0], [1], [0, 0, 1, 1], [], []>} : vector<17x50xf32>, vector<50x8xf32>, vector<17x8xf32> -> vector<17x8xf32>
    %175 = vector.extract_strided_slice %174 {offsets = [0, 0], sizes = [16, 8], strides = [1, 1]} : vector<17x8xf32> to vector<16x8xf32>
    %176 = vector.extract_strided_slice %174 {offsets = [16, 0], sizes = [1, 8], strides = [1, 1]} : vector<17x8xf32> to vector<1x8xf32>
    %177 = arith.maximumf %157, %176 : vector<1x8xf32>
    %178 = arith.subf %157, %177 : vector<1x8xf32>
    %179 = math.exp %178 : vector<1x8xf32>
    %180 = arith.subf %176, %177 : vector<1x8xf32>
    %181 = math.exp %180 : vector<1x8xf32>
    %182 = arith.mulf %163, %179 : vector<1x8xf32>
    %183 = arith.addf %182, %181 : vector<1x8xf32>
    %184 = vector.broadcast %179 : vector<1x8xf32> to vector<16x8xf32>
    %185 = arith.mulf %168, %184 : vector<16x8xf32>
    %186 = vector.broadcast %181 : vector<1x8xf32> to vector<16x8xf32>
    %187 = arith.mulf %186, %175 : vector<16x8xf32>
    %188 = arith.addf %185, %187 : vector<16x8xf32>
    %189 = vector.broadcast %183 : vector<1x8xf32> to vector<16x8xf32>
    %190 = arith.divf %188, %189 : vector<16x8xf32>
    %cst_29 = arith.constant dense<0.000000e+00> : vector<128x8xf32>
    %191 = tpu.matmul %1, %37, %cst_29 {dimension_numbers = #tpu.dot_dimension_numbers<[1], [0], [0], [1], [0, 0, 1, 1], [], []>} : vector<128x48xf32>, vector<48x8xf32>, vector<128x8xf32> -> vector<128x8xf32>
    %cst_30 = arith.constant dense<0.000000e+00> : vector<128x8xf32>
    %192 = tpu.matmul %2, %190, %cst_30 {dimension_numbers = #tpu.dot_dimension_numbers<[1], [0], [0], [1], [0, 0, 1, 1], [], []>} : vector<128x16xf32>, vector<16x8xf32>, vector<128x8xf32> -> vector<128x8xf32>
    %193 = arith.addf %191, %192 : vector<128x8xf32>
    %194 = vector.broadcast %7 : vector<128x1xf32> to vector<128x8xf32>
    %195 = arith.addf %193, %194 : vector<128x8xf32>
    %cst_31 = arith.constant 0.000000e+00 : f32
    %196 = vector.broadcast %cst_31 : f32 to vector<128x8xf32>
    %197 = arith.maximumf %195, %196 : vector<128x8xf32>
    %198 = vector.broadcast %8 : vector<128x1xf32> to vector<128x8xf32>
    %199 = arith.mulf %197, %198 : vector<128x8xf32>
    %cst_32 = arith.constant dense<0.000000e+00> : vector<8xf32>
    %200 = vector.multi_reduction <add>, %199, %cst_32 [0] : vector<128x8xf32> to vector<8xf32>
    %201 = vector.shape_cast %200 : vector<8xf32> to vector<1x8xf32>
    %202 = vector.broadcast %9 : vector<1x1xf32> to vector<1x8xf32>
    %203 = arith.addf %201, %202 : vector<1x8xf32>
    %c0_33 = arith.constant 0 : index
    %c0_34 = arith.constant 0 : index
    %204 = vector.load %arg4[%c0_33, %c0_34] : memref<1x8xf32, #tpu.memory_space<vmem>>, vector<1x8xf32>
    tpu.vector_store %arg4[%c0_33, %c0_34], %203 {strides = array<i32>} : memref<1x8xf32, #tpu.memory_space<vmem>>, vector<1x8xf32>,
    return
  }
  func.func @transform_0(%arg0: i32) -> (i32, i32) {
    %c0_i32 = arith.constant 0 : i32
    %c0_i32_0 = arith.constant 0 : i32
    return %c0_i32, %arg0 : i32, i32
  }
  func.func @transform_1(%arg0: i32) -> (i32, i32) {
    %c0_i32 = arith.constant 0 : i32
    %c0_i32_0 = arith.constant 0 : i32
    return %c0_i32, %arg0 : i32, i32
  }
  func.func @transform_2(%arg0: i32) -> (i32, i32) {
    %c0_i32 = arith.constant 0 : i32
    %c0_i32_0 = arith.constant 0 : i32
    %c0_i32_1 = arith.constant 0 : i32
    return %c0_i32, %c0_i32_0 : i32, i32
  }
  func.func @transform_3(%arg0: i32) -> (i32, i32) {
    %c0_i32 = arith.constant 0 : i32
    %c0_i32_0 = arith.constant 0 : i32
    return %c0_i32, %arg0 : i32, i32
  }
}

</mosaic_0001>

<bundles_post_ra>
// kernel: tpu_custom_call.1
= control target key start
LH: loop header
LB: loop body
LE: loop exit
PB: predicated region body
PF: predicated region fallthrough
CT: control target
= control target key end

     0   :  { %8 = vsyncpa [#allocation3], 0  ;;  %s3504_s0 = inlined_call_operand.vmem [shape: f32[32,8], index: 0, kind: input, shape index: {}]   ;;  %s3505_s1 = inlined_call_operand.vmem [shape: s32[8,8], index: 1, kind: input, shape index: {}]   ;;  %s3506_s2 = inlined_call_operand.hbm [shape: f32[736,128], index: 2, kind: input, shape index: {}]   ;;  %s3507_s3 = inlined_call_operand.hbm [shape: f32[1,8], index: 3, kind: output, shape index: {}]  }
   0x1   :  { %9 = vsyncpa [#allocation4], 0  ;;  %s2781_s12 = smov [#allocation2]  }
   0x2   :  { %s19_s13 = sshll.u32 %s2781_s12, 4  ;;  %s20_s13 = int_to_ptr.vmem [resolvable:$true] %s19_s13 }
   0x3   :  { %s2745_s14 = scalar_lea.vmem %s20_s13, 11776  ;;  %p2750_p1 = scmp.lt.s32.totalorder %s20_s13, %s20_s13 }
   0x4   :  { %p2746_p0 = scmp.ne.s32.totalorder %s20_s13, %s2745_s14  ;;  %p2751_p2 = scmp.lt.s32.totalorder %s2745_s14, %s2745_s14 }
   0x6   :  { %p2752_p3 = por %p2751_p2, %p2750_p1 }
   0x8   :  { %p2753_p4 = pnand %p2752_p3, %p2746_p0 }
   0xa   :  { %2756 = shalt.err (!%p2753_p4)
}
   0xb   :  { %s2782_s15 = smov 128   ;;  %s2783_s16 = smov 8  }
   0xc   :  { %25 = dma.hbm_to_vmem [thread:$0]  %s3506_s2, 11776, %s20_s13, [#allocation3], %s2782_s15, %s2782_s15, %s2783_s16  }
   0xd   :  { %2777 = dma.done.wait [#allocation3], 11776  }
   0xe   :  { %2778 = vsyncadd [#allocation3], 4294955520  ;;  %v408_v0 = vlaneseq  ;;  %v2784_v1 = vmov 0.0   ;;  %vm2785_vm0 = vmmov 0   ;;  %v2786_v3 = vmov 0   ;;  %v124_v6 = vld [vmem:[%s3504_s0 + $0x18] sm:$0xff] }
   0xf   :  { %2435 = vmatprep.subr.mxu1 %v2784_v1  ;;  %2449 = vmatprep.mubr.msk.f32.mxu1 %vm2785_vm0, %v2784_v1  ;;  %vm155_vm1 = vcmask 261120   ;;  %v123_v7 = vld [vmem:[%s3504_s0 + $0x10] sm:$0xff]  ;;  %v2833_v9 = vld [vmem:[%s3505_s1] sm:$0xff]  ;;  %v122_v12 = vld [vmem:[%s3504_s0 + $0x8] sm:$0xff]  ;;  %vm451_vm2 = vcmask 1041408   ;;  %v2787_v22 = vmov 1.0  }
  0x10   :  { %v2813_v2 = vshrl.u32 %v408_v0, 7  ;;  %2703 = vset.pattern.permute.xlu0 %v2786_v3  ;;  %2704 = vset.pattern.permute.xlu1 %v2786_v3  ;;  %v29_v11 = vld [vmem:[#allocation2] sm:$0xff]  ;;  %v70_v17 = vld [vmem:[#allocation2 + $0x148] sm:$0xff]  ;;  %v31_v25 = vld [vmem:[#allocation2 + $0x10] sm:$0xff]  ;;  %vm441_vm15 = vcmask 408576  }
  0x11   :  { %2418 = vmatprep.subr.mxu0 %v124_v6  ;;  %2426 = vmatprep.mubr.msk.f32.mxu0 %vm155_vm1, %v29_v11  ;;  %v121_v16 = vld [vmem:[%s3504_s0] sm:$0xff]  ;;  %v30_v20 = vld [vmem:[#allocation2 + $0x8] sm:$0xff]  ;;  %v32_v27 = vld [vmem:[#allocation2 + $0x18] sm:$0xff]  ;;  %s2788_s0 = smov [#allocation5]  }
  0x12   :  { %v2818_v4 = vsub.s32 0, %v2813_v2  ;;  %v537_v5 = vsub.s32 1, %v2813_v2  ;;  %v2828_v8 = vadd.s32 48, %v2813_v2  ;;  %v2836_v10 = vadd.s32 40, %v2813_v2  ;;  %2419 = vmatpush3.msra.mxu0 %v124_v6  ;;  %127 = vperm.xlu0 %2703, %v70_v17   ;;  %v33_v29 = vld [vmem:[#allocation2 + $0x20] sm:$0xff]  ;;  %v34_v32 = vld [vmem:[#allocation2 + $0x28] sm:$0xff] }
  0x13   :  { %2420 = vmatprep.subr.mxu0 %v123_v7  ;;  %v2850_v15 = vadd.s32 32, %v2813_v2  ;;  %v2863_v19 = vadd.s32 24, %v2813_v2  ;;  %v2870_v21 = vadd.s32 16, %v2813_v2  ;;  %v667_v24 = vsub.s32 2, %v2813_v2  ;;  %v2919_v33 = vld [vmem:[#allocation2 + $0x130] sm:$0xff]  ;;  %v2978_v37 = vld [vmem:[#allocation2 + $0x138] sm:$0xff] }
  0x14   :  { %v2843_v13 = vrot.slane %v2833_v9, %v2818_v4  ;;  %v2847_v14 = vrot.slane %v2833_v9, %v537_v5  ;;  %2421 = vmatpush3.msra.mxu0 %v123_v7  ;;  %v2882_v26 = vadd.s32 8, %v2813_v2  ;;  %v798_v30 = vsub.s32 3, %v2813_v2  ;;  %v3004_v40 = vld [vmem:[#allocation2 + $0x140] sm:$0x1]  ;;  %v71_v43 = vld [vmem:[#allocation2 + $0x150] sm:$0xff]  ;;  %v72_v46 = vld [vmem:[#allocation2 + $0x158] sm:$0xff] }
  0x15   :  { %2422 = vmatprep.subr.mxu0 %v122_v12  ;;  %v2897_v28 = vrot.slane %v2833_v9, %v667_v24  ;;  %v1322_v31 = vsub.s32 7, %v2813_v2  ;;  %v929_v39 = vsub.s32 4, %v2813_v2  ;;  %v1060_v42 = vsub.s32 5, %v2813_v2  ;;  %v74_v47 = vld [vmem:[#allocation2 + $0x168] sm:$0xff]  ;;  %137 = vperm.xlu1 %2704, %v72_v46   ;;  %v73_v49 = vld [vmem:[#allocation2 + $0x160] sm:$0xff]  ;;  %v75_v53 = vld [vmem:[#allocation2 + $0x170] sm:$0xff] }
  0x16   :  { %vm426_vm3 = vcmp.eq.s32.totalorder %v2828_v8, %v2843_v13  ;;  %vm425_vm4 = vcmp.eq.s32.totalorder %v2836_v10, %v2843_v13  ;;  %vm545_vm5 = vcmp.eq.s32.totalorder %v2828_v8, %v2847_v14  ;;  %2423 = vmatpush3.msra.mxu0 %v122_v12  ;;  %vm424_vm6 = vcmp.eq.s32.totalorder %v2850_v15, %v2843_v13  ;;  %v81_v51 = vld [vmem:[#allocation2 + $0x1a0] sm:$0xff]  ;;  %v87_v54 = vld [vmem:[#allocation2 + $0x1d0] sm:$0xff]  ;;  %v80_v56 = vld [vmem:[#allocation2 + $0x198] sm:$0xff]  ;;  %s2105_s27 = sshll.u32 %s2788_s0, 4  ;;  %s2106_s27 = int_to_ptr.vmem [resolvable:$true] %s2105_s27 }
  0x17   :  { %v2126_v18 = vsel %vm426_vm3, 1.0, %v2784_v1  ;;  %2424 = vmatprep.subr.mxu0 %v121_v16  ;;  %v2143_v23 = vsel %vm545_vm5, 1.0, %v2784_v1  ;;  %vm423_vm7 = vcmp.eq.s32.totalorder %v2863_v19, %v2843_v13  ;;  %vm544_vm8 = vcmp.eq.s32.totalorder %v2836_v10, %v2847_v14  ;;  %132 = vperm.xlu0 %2703, %v71_v43   ;;  %v86_v57 = vld [vmem:[#allocation2 + $0x1c8] sm:$0xff]  ;;  %v79_v59 = vld [vmem:[#allocation2 + $0x190] sm:$0xff]  ;;  %v85_v60 = vld [vmem:[#allocation2 + $0x1c0] sm:$0xff]  ;;  %s2757_s28 = scalar_lea.vmem %s2106_s27, 16  ;;  %p2762_p6 = scmp.lt.s32.totalorder %s2106_s27, %s2106_s27 }
  0x18   :  { %2436 = vmatpush3.msk.msra.mxu1 %vm451_vm2, %v2126_v18  ;;  %2425 = vmatpush3.msra.mxu0 %v121_v16  ;;  %vm422_vm9 = vcmp.eq.s32.totalorder %v2870_v21, %v2843_v13  ;;  %vm543_vm10 = vcmp.eq.s32.totalorder %v2850_v15, %v2847_v14  ;;  %vm421_vm11 = vcmp.eq.s32.totalorder %v2882_v26, %v2843_v13  ;;  %v1191_v50 = vsub.s32 6, %v2813_v2  ;;  %v78_v61 = vld [vmem:[#allocation2 + $0x188] sm:$0xff]  ;;  %v84_v62 = vld [vmem:[#allocation2 + $0x1b8] sm:$0xff]  ;;  %v77_v63 = vld [vmem:[#allocation2 + $0x180] sm:$0xff]  ;;  %p2758_p5 = scmp.ne.s32.totalorder %s2106_s27, %s2757_s28  ;;  %s2761_s29 = scalar_lea.vmem %s2106_s27, 32 }
  0x19   :  { %2437 = vmatprep.subr.mxu1 %v2784_v1  ;;  %2427 = vmatmul.mubr.msk.f32.vlgmr.msra.gmra.mxu0 %vm155_vm1, %v30_v20  ;;  %vm542_vm12 = vcmp.eq.s32.totalorder %v2863_v19, %v2847_v14  ;;  %vm420_vm13 = vcmp.eq.s32.totalorder %v2813_v2, %v2843_v13  ;;  %vm675_vm14 = vcmp.eq.s32.totalorder %v2828_v8, %v2897_v28  ;;  %v83_v0 = vld [vmem:[#allocation2 + $0x1b0] sm:$0xff]  ;;  %v76_v3 = vld [vmem:[#allocation2 + $0x178] sm:$0xff]  ;;  %v82_v6 = vld [vmem:[#allocation2 + $0x1a8] sm:$0xff]  ;;  %p2763_p7 = scmp.lt.s32.totalorder %s2761_s29, %s2757_s28 }
  0x1a   :  { %2438 = vmatpush3.msk.msra.mxu1 %vm425_vm4, %v2787_v22  ;;  %2458 = vmatprep.subr.mxu0 %v2784_v1  ;;  %vm541_vm3 = vcmp.eq.s32.totalorder %v2870_v21, %v2847_v14  ;;  %v2926_v34 = vrot.slane %v2833_v9, %v798_v30  ;;  %v2929_v35 = vrot.slane %v2833_v9, %v1322_v31  ;;  %v2160_v36 = vsel %vm675_vm14, 1.0, %v2784_v1  ;;  %v88_v5 = vld [vmem:[#allocation2 + $0x1d8] sm:$0xff]  ;;  %v90_v7 = vld [vmem:[#allocation2 + $0x1e8] sm:$0xff]  ;;  %v93_v11 = vld [vmem:[#allocation2 + $0x200] sm:$0xff] }
  0x1b   :  { %2439 = vmatprep.subr.mxu1 %v2784_v1  ;;  %2459 = vmatpush3.msk.msra.mxu0 %vm451_vm2, %v2143_v23  ;;  %vm540_vm4 = vcmp.eq.s32.totalorder %v2882_v26, %v2847_v14  ;;  %vm674_vm5 = vcmp.eq.s32.totalorder %v2836_v10, %v2897_v28  ;;  %vm673_vm14 = vcmp.eq.s32.totalorder %v2850_v15, %v2897_v28  ;;  %v106_v12 = vld [vmem:[#allocation2 + $0x268] sm:$0xff]  ;;  %v105_v13 = vld [vmem:[#allocation2 + $0x260] sm:$0xff]  ;;  %v95_v16 = vld [vmem:[#allocation2 + $0x210] sm:$0xff]  ;;  %p2764_p8 = por %p2763_p7, %p2762_p6 }
  0x1c   :  { %2440 = vmatpush3.msk.msra.mxu1 %vm424_vm6, %v2787_v22  ;;  %2460 = vmatprep.subr.mxu0 %v2784_v1  ;;  %vm539_vm6 = vcmp.eq.s32.totalorder %v2813_v2, %v2847_v14  ;;  %v3015_v41 = vrot.slane %v2833_v9, %v929_v39  ;;  %v3051_v45 = vrot.slane %v2833_v9, %v1060_v42  ;;  %v94_v14 = vld [vmem:[#allocation2 + $0x208] sm:$0xff]  ;;  %v96_v17 = vld [vmem:[#allocation2 + $0x218] sm:$0xff]  ;;  %v109_v18 = vld [vmem:[#allocation2 + $0x280] sm:$0xff] }
  0x1d   :  { %2441 = vmatprep.subr.mxu1 %v2784_v1  ;;  %2429 = vmatprep.mubr.msk.f32.mxu0 %vm155_vm1, %v31_v25  ;;  %v3107_v52 = vrot.slane %v2833_v9, %v1191_v50  ;;  %v91_v9 = vld [vmem:[#allocation2 + $0x1f0] sm:$0xff]  ;;  %v110_v20 = vld [vmem:[#allocation2 + $0x288] sm:$0xff]  ;;  %v112_v24 = vld [vmem:[#allocation2 + $0x298] sm:$0xff]  ;;  %p2765_p9 = pnand %p2764_p8, %p2758_p5 }
  0x1e   :  { %2442 = vmatpush3.msk.msra.mxu1 %vm423_vm7, %v2787_v22  ;;  %2461 = vmatpush3.msk.msra.mxu0 %vm544_vm8, %v2787_v22  ;;  %vm1329_vm7 = vcmp.eq.s32.totalorder %v2836_v10, %v2929_v35  ;;  %vm1328_vm8 = vcmp.eq.s32.totalorder %v2850_v15, %v2929_v35  ;;  %v99_v23 = vld [vmem:[#allocation2 + $0x230] sm:$0xff]  ;;  %v100_v25 = vld [vmem:[#allocation2 + $0x238] sm:$0xff] }
  0x1f   :  { %2443 = vmatprep.subr.mxu1 %v2784_v1  ;;  %2430 = vmatmul.mubr.msk.f32.gmra.mxu0 %vm155_vm1, %v32_v27  ;;  %v101_v27 = vld [vmem:[#allocation2 + $0x240] sm:$0xff]  ;;  %v115_v30 = vld [vmem:[#allocation2 + $0x2b0] sm:$0xff] }
  0x20   :  { %2444 = vmatpush3.msk.msra.mxu1 %vm422_vm9, %v2787_v22  ;;  %2462 = vmatprep.subr.mxu0 %v2784_v1  ;;  %vm1327_vm9 = vcmp.eq.s32.totalorder %v2863_v19, %v2929_v35  ;;  %v103_v31 = vld [vmem:[#allocation2 + $0x250] sm:$0xff] }
  0x21   :  { %2445 = vmatprep.subr.mxu1 %v2784_v1  ;;  %2463 = vmatpush3.msk.msra.mxu0 %vm543_vm10, %v2787_v22  ;;  %vm1326_vm10 = vcmp.eq.s32.totalorder %v2870_v21, %v2929_v35 }
  0x22   :  { %2446 = vmatpush3.msk.msra.mxu1 %vm421_vm11, %v2787_v22  ;;  %2464 = vmatprep.subr.mxu0 %v2784_v1  ;;  %vm1325_vm11 = vcmp.eq.s32.totalorder %v2882_v26, %v2929_v35 }
  0x23   :  { %2432 = vmatprep.mubr.msk.f32.mxu0 %vm155_vm1, %v33_v29  ;;  %2447 = vmatprep.subr.mxu1 %v2784_v1  ;;  %v102_v29 = vld [vmem:[#allocation2 + $0x248] sm:$0xff] }
  0x24   :  { %2465 = vmatpush3.msk.msra.mxu0 %vm542_vm12, %v2787_v22  ;;  %2448 = vmatpush3.msk.msra.mxu1 %vm420_vm13, %v2787_v22  ;;  %vm1324_vm12 = vcmp.eq.s32.totalorder %v2813_v2, %v2929_v35  ;;  %vm806_vm13 = vcmp.eq.s32.totalorder %v2828_v8, %v2926_v34 }
  0x25   :  { %2433 = vmatmul.mubr.msk.f32.gmra.mxu0 %vm155_vm1, %v34_v32  ;;  %2466 = vmatprep.subr.mxu0 %v2784_v1  ;;  %vm1330_vm1 = vcmp.eq.s32.totalorder %v2828_v8, %v2929_v35  ;;  %v2177_v38 = vsel %vm806_vm13, 1.0, %v2784_v1  ;;  %vm670_vm13 = vcmp.eq.s32.totalorder %v2882_v26, %v2897_v28  ;;  %v116_v32 = vld [vmem:[#allocation2 + $0x2b8] sm:$0xff] }
  0x26   :  { %2450 = vmatmul.mubr.msk.f32.vlgmr.msra.gmra.mxu1 %vm441_vm15, %v2919_v33  ;;  %2467 = vmatpush3.msk.msra.mxu0 %vm541_vm3, %v2787_v22  ;;  %vm672_vm3 = vcmp.eq.s32.totalorder %v2863_v19, %v2897_v28  ;;  %v2245_v58 = vsel %vm1330_vm1, 1.0, %v2784_v1  ;;  %vm1195_vm1 = vcmp.eq.s32.totalorder %v2870_v21, %v3107_v52  ;;  %v120_v35 = vld [vmem:[#allocation2 + $0x2d8] sm:$0x1] }
  0x27   :  { %2481 = vmatprep.subr.mxu1 %v2784_v1  ;;  %2468 = vmatprep.subr.mxu0 %v2784_v1 }
  0x28   :  { %2482 = vmatpush3.msk.msra.mxu1 %vm451_vm2, %v2160_v36  ;;  %2469 = vmatpush3.msk.msra.mxu0 %vm540_vm4, %v2787_v22  ;;  %vm805_vm4 = vcmp.eq.s32.totalorder %v2836_v10, %v2926_v34  ;;  %v119_v36 = vld [vmem:[#allocation2 + $0x2d0] sm:$0xff] }
  0x29   :  { %2483 = vmatprep.subr.mxu1 %v2784_v1  ;;  %2470 = vmatprep.subr.mxu0 %v2784_v1 }
  0x2a   :  { %2484 = vmatpush3.msk.msra.mxu1 %vm674_vm5, %v2787_v22  ;;  %2471 = vmatpush3.msk.msra.mxu0 %vm539_vm6, %v2787_v22  ;;  %vm671_vm5 = vcmp.eq.s32.totalorder %v2870_v21, %v2897_v28  ;;  %vm804_vm6 = vcmp.eq.s32.totalorder %v2850_v15, %v2926_v34 }
  0x2b   :  { %2472 = vmatprep.mubr.msk.f32.mxu0 %vm2785_vm0, %v2784_v1  ;;  %2485 = vmatprep.subr.mxu1 %v2784_v1 }
  0x2c   :  { %2452 = vmatprep.mubr.msk.f32.mxu1 %vm2785_vm0, %v2784_v1  ;;  %2473 = vmatmul.mubr.msk.f32.vlgmr.msra.gmra.mxu0 %vm441_vm15, %v2919_v33 }
  0x2d   :  { %2486 = vmatpush3.msk.msra.mxu1 %vm673_vm14, %v2787_v22  ;;  %2504 = vmatprep.subr.mxu0 %v2784_v1  ;;  %vm803_vm14 = vcmp.eq.s32.totalorder %v2863_v19, %v2926_v34 }
  0x2e   :  { %2453 = vmatmul.mubr.msk.f32.gmra.mxu1 %vm441_vm15, %v2978_v37  ;;  %2487 = vmatprep.subr.mxu1 %v2784_v1 }
  0x2f   :  { %2505 = vmatpush3.msk.msra.mxu0 %vm451_vm2, %v2177_v38  ;;  %2488 = vmatpush3.msk.msra.mxu1 %vm672_vm3, %v2787_v22  ;;  %vm669_vm3 = vcmp.eq.s32.totalorder %v2813_v2, %v2897_v28  ;;  %v114_v28 = vld [vmem:[#allocation2 + $0x2a8] sm:$0xff] }
  0x30   :  { %2506 = vmatprep.subr.mxu0 %v2784_v1  ;;  %2475 = vmatprep.mubr.msk.f32.mxu0 %vm2785_vm0, %v2784_v1 }
  0x31   :  { %2489 = vmatprep.subr.mxu1 %v2784_v1  ;;  %2507 = vmatpush3.msk.msra.mxu0 %vm805_vm4, %v2787_v22  ;;  %vm937_vm4 = vcmp.eq.s32.totalorder %v2828_v8, %v3015_v41 }
  0x32   :  { %2455 = vmatprep.mubr.msk.f32.mxu1 %vm2785_vm0, %v2784_v1  ;;  %2476 = vmatmul.mubr.msk.f32.gmra.mxu0 %vm441_vm15, %v2978_v37  ;;  %v2194_v44 = vsel %vm937_vm4, 1.0, %v2784_v1  ;;  %vm935_vm4 = vcmp.eq.s32.totalorder %v2850_v15, %v3015_v41 }
  0x33   :  { %2490 = vmatpush3.msk.msra.mxu1 %vm671_vm5, %v2787_v22  ;;  %2508 = vmatprep.subr.mxu0 %v2784_v1  ;;  %vm802_vm5 = vcmp.eq.s32.totalorder %v2870_v21, %v2926_v34 }
  0x34   :  { %2456 = vmatmul.mubr.msk.f32.gmra.mxu1 %vm441_vm15, %v3004_v40  ;;  %2491 = vmatprep.subr.mxu1 %v2784_v1 }
  0x35   :  { %2509 = vmatpush3.msk.msra.mxu0 %vm804_vm6, %v2787_v22  ;;  %2492 = vmatpush3.msk.msra.mxu1 %vm670_vm13, %v2787_v22  ;;  %vm801_vm6 = vcmp.eq.s32.totalorder %v2882_v26, %v2926_v34  ;;  %vm936_vm13 = vcmp.eq.s32.totalorder %v2836_v10, %v3015_v41 }
  0x36   :  { %2510 = vmatprep.subr.mxu0 %v2784_v1  ;;  %2478 = vmatprep.mubr.msk.f32.mxu0 %vm2785_vm0, %v2784_v1 }
  0x37   :  { %2493 = vmatprep.subr.mxu1 %v2784_v1  ;;  %2511 = vmatpush3.msk.msra.mxu0 %vm803_vm14, %v2787_v22  ;;  %vm800_vm14 = vcmp.eq.s32.totalorder %v2813_v2, %v2926_v34  ;;  %v117_v34 = vld [vmem:[#allocation2 + $0x2c0] sm:$0xff] }
  0x38   :  { %2479 = vmatmul.mubr.msk.f32.gmra.mxu0 %vm441_vm15, %v3004_v40  ;;  %2494 = vmatpush3.msk.msra.mxu1 %vm669_vm3, %v2787_v22  ;;  %vm1068_vm3 = vcmp.eq.s32.totalorder %v2828_v8, %v3051_v45 }
  0x39   :  { %2495 = vmatprep.mubr.msk.f32.mxu1 %vm2785_vm0, %v2784_v1  ;;  %2512 = vmatprep.subr.mxu0 %v2784_v1  ;;  %v2211_v48 = vsel %vm1068_vm3, 1.0, %v2784_v1  ;;  %vm932_vm3 = vcmp.eq.s32.totalorder %v2882_v26, %v3015_v41 }
  0x3a   :  { %2496 = vmatmul.mubr.msk.f32.vlgmr.msra.gmra.mxu1 %vm441_vm15, %v2919_v33  ;;  %2513 = vmatpush3.msk.msra.mxu0 %vm802_vm5, %v2787_v22  ;;  %vm934_vm5 = vcmp.eq.s32.totalorder %v2863_v19, %v3015_v41 }
  0x3b   :  { %2527 = vmatprep.subr.mxu1 %v2784_v1  ;;  %2514 = vmatprep.subr.mxu0 %v2784_v1 }
  0x3c   :  { %2528 = vmatpush3.msk.msra.mxu1 %vm451_vm2, %v2194_v44  ;;  %2515 = vmatpush3.msk.msra.mxu0 %vm801_vm6, %v2787_v22  ;;  %vm1067_vm6 = vcmp.eq.s32.totalorder %v2836_v10, %v3051_v45 }
  0x3d   :  { %2529 = vmatprep.subr.mxu1 %v2784_v1  ;;  %2498 = vmatprep.mubr.msk.f32.mxu1 %vm2785_vm0, %v2784_v1 }
  0x3e   :  { %2516 = vmatprep.subr.mxu0 %v2784_v1  ;;  %2530 = vmatpush3.msk.msra.mxu1 %vm936_vm13, %v2787_v22  ;;  %vm933_vm13 = vcmp.eq.s32.totalorder %v2870_v21, %v3015_v41 }
  0x3f   :  { %2517 = vmatpush3.msk.msra.mxu0 %vm800_vm14, %v2787_v22  ;;  %2499 = vmatmul.mubr.msk.f32.gmra.mxu1 %vm441_vm15, %v2978_v37  ;;  %vm1066_vm14 = vcmp.eq.s32.totalorder %v2850_v15, %v3051_v45 }
  0x40   :  { %2518 = vmatprep.mubr.msk.f32.mxu0 %vm2785_vm0, %v2784_v1  ;;  %2531 = vmatprep.subr.mxu1 %v2784_v1 }
  0x41   :  { %147 = vperm.xlu0 %2703, %v74_v47   ;;  %2519 = vmatmul.mubr.msk.f32.vlgmr.msra.gmra.mxu0 %vm441_vm15, %v2919_v33 }
  0x42   :  { %2532 = vmatpush3.msk.msra.mxu1 %vm935_vm4, %v2787_v22  ;;  %2550 = vmatprep.subr.mxu0 %v2784_v1  ;;  %vm1065_vm4 = vcmp.eq.s32.totalorder %v2863_v19, %v3051_v45 }
  0x43   :  { %2533 = vmatprep.subr.mxu1 %v2784_v1  ;;  %2551 = vmatpush3.msk.msra.mxu0 %vm451_vm2, %v2211_v48 }
  0x44   :  { %2501 = vmatprep.mubr.msk.f32.mxu1 %vm2785_vm0, %v2784_v1  ;;  %2534 = vmatpush3.msk.msra.mxu1 %vm934_vm5, %v2787_v22  ;;  %vm931_vm5 = vcmp.eq.s32.totalorder %v2813_v2, %v3015_v41 }
  0x45   :  { %2552 = vmatprep.subr.mxu0 %v2784_v1  ;;  %2502 = vmatmul.mubr.msk.f32.gmra.mxu1 %vm441_vm15, %v3004_v40 }
  0x46   :  { %2521 = vmatprep.mubr.msk.f32.mxu0 %vm2785_vm0, %v2784_v1  ;;  %2535 = vmatprep.subr.mxu1 %v2784_v1 }
  0x47   :  { %2553 = vmatpush3.msk.msra.mxu0 %vm1067_vm6, %v2787_v22  ;;  %142 = vperm.xlu1 %2704, %v73_v49   ;;  %vm1199_vm6 = vcmp.eq.s32.totalorder %v2828_v8, %v3107_v52  ;;  %v92_v8 = vld [vmem:[#allocation2 + $0x1f8] sm:$0xff] }
  0x48   :  { %362 = vperm.xlu0 %2703, %v81_v51   ;;  %2522 = vmatmul.mubr.msk.f32.gmra.mxu0 %vm441_vm15, %v2978_v37  ;;  %v2228_v55 = vsel %vm1199_vm6, 1.0, %v2784_v1  ;;  %vm1196_vm6 = vcmp.eq.s32.totalorder %v2863_v19, %v3107_v52  ;;  %v97_v19 = vld [vmem:[#allocation2 + $0x220] sm:$0xff] }
  0x49   :  { %2536 = vmatpush3.msk.msra.mxu1 %vm933_vm13, %v2787_v22  ;;  %2554 = vmatprep.subr.mxu0 %v2784_v1  ;;  %vm1064_vm13 = vcmp.eq.s32.totalorder %v2870_v21, %v3051_v45  ;;  %v98_v21 = vld [vmem:[#allocation2 + $0x228] sm:$0xff] }
  0x4a   :  { %2537 = vmatprep.subr.mxu1 %v2784_v1  ;;  %2555 = vmatpush3.msk.msra.mxu0 %vm1066_vm14, %v2787_v22  ;;  %vm1063_vm14 = vcmp.eq.s32.totalorder %v2882_v26, %v3051_v45 }
  0x4b   :  { %2538 = vmatpush3.msk.msra.mxu1 %vm932_vm3, %v2787_v22  ;;  %2556 = vmatprep.subr.mxu0 %v2784_v1  ;;  %vm1198_vm3 = vcmp.eq.s32.totalorder %v2836_v10, %v3107_v52  ;;  %v104_v10 = vld [vmem:[#allocation2 + $0x258] sm:$0xff] }
  0x4c   :  { %2524 = vmatprep.mubr.msk.f32.mxu0 %vm2785_vm0, %v2784_v1  ;;  %2539 = vmatprep.subr.mxu1 %v2784_v1 }
  0x4d   :  { %2557 = vmatpush3.msk.msra.mxu0 %vm1065_vm4, %v2787_v22  ;;  %152 = vperm.xlu1 %2704, %v75_v53   ;;  %vm1062_vm4 = vcmp.eq.s32.totalorder %v2813_v2, %v3051_v45 }
  0x4e   :  { %398 = vperm.xlu0 %2703, %v87_v54   ;;  %2525 = vmatmul.mubr.msk.f32.gmra.mxu0 %vm441_vm15, %v3004_v40 }
  0x4f   :  { %2540 = vmatpush3.msk.msra.mxu1 %vm931_vm5, %v2787_v22  ;;  %2541 = vmatprep.mubr.msk.f32.mxu1 %vm2785_vm0, %v2784_v1  ;;  %vm1197_vm5 = vcmp.eq.s32.totalorder %v2850_v15, %v3107_v52  ;;  %v107_v15 = vld [vmem:[#allocation2 + $0x270] sm:$0xff] }
  0x50   :  { %2558 = vmatprep.subr.mxu0 %v2784_v1  ;;  %2542 = vmatmul.mubr.msk.f32.vlgmr.msra.gmra.mxu1 %vm441_vm15, %v2919_v33 }
  0x51   :  { %2559 = vmatpush3.msk.msra.mxu0 %vm1064_vm13, %v2787_v22  ;;  %2573 = vmatprep.subr.mxu1 %v2784_v1 }
  0x52   :  { %2560 = vmatprep.subr.mxu0 %v2784_v1  ;;  %2574 = vmatpush3.msk.msra.mxu1 %vm451_vm2, %v2228_v55 }
  0x53   :  { %2561 = vmatpush3.msk.msra.mxu0 %vm1063_vm14, %v2787_v22  ;;  %2575 = vmatprep.subr.mxu1 %v2784_v1 }
  0x54   :  { %357 = vperm.xlu1 %2704, %v80_v56   ;;  %393 = vperm.xlu0 %2703, %v86_v57  }
  0x55   :  { %2544 = vmatprep.mubr.msk.f32.mxu1 %vm2785_vm0, %v2784_v1  ;;  %2562 = vmatprep.subr.mxu0 %v2784_v1 }
  0x56   :  { %2576 = vmatpush3.msk.msra.mxu1 %vm1198_vm3, %v2787_v22  ;;  %2563 = vmatpush3.msk.msra.mxu0 %vm1062_vm4, %v2787_v22 }
  0x57   :  { %2545 = vmatmul.mubr.msk.f32.gmra.mxu1 %vm441_vm15, %v2978_v37  ;;  %2564 = vmatprep.mubr.msk.f32.mxu0 %vm2785_vm0, %v2784_v1 }
  0x58   :  { %2577 = vmatprep.subr.mxu1 %v2784_v1  ;;  %2565 = vmatmul.mubr.msk.f32.vlgmr.msra.gmra.mxu0 %vm441_vm15, %v2919_v33 }
  0x59   :  { %2578 = vmatpush3.msk.msra.mxu1 %vm1197_vm5, %v2787_v22  ;;  %2596 = vmatprep.subr.mxu0 %v2784_v1 }
  0x5a   :  { %2579 = vmatprep.subr.mxu1 %v2784_v1  ;;  %2597 = vmatpush3.msk.msra.mxu0 %vm451_vm2, %v2245_v58  ;;  %vm1194_vm2 = vcmp.eq.s32.totalorder %v2882_v26, %v3107_v52  ;;  %v113_v26 = vld [vmem:[#allocation2 + $0x2a0] sm:$0xff] }
  0x5b   :  { %352 = vperm.xlu1 %2704, %v79_v59   ;;  %388 = vperm.xlu0 %2703, %v85_v60  }
  0x5c   :  { %2547 = vmatprep.mubr.msk.f32.mxu1 %vm2785_vm0, %v2784_v1  ;;  %2580 = vmatpush3.msk.msra.mxu1 %vm1196_vm6, %v2787_v22 }
  0x5d   :  { %2598 = vmatprep.subr.mxu0 %v2784_v1  ;;  %2548 = vmatmul.mubr.msk.f32.gmra.mxu1 %vm441_vm15, %v3004_v40 }
  0x5e   :  { %2567 = vmatprep.mubr.msk.f32.mxu0 %vm2785_vm0, %v2784_v1  ;;  %2581 = vmatprep.subr.mxu1 %v2784_v1 }
  0x5f   :  { %2599 = vmatpush3.msk.msra.mxu0 %vm1329_vm7, %v2787_v22  ;;  %2582 = vmatpush3.msk.msra.mxu1 %vm1195_vm1, %v2787_v22  ;;  %vm1193_vm7 = vcmp.eq.s32.totalorder %v2813_v2, %v3107_v52  ;;  %v89_v2 = vld [vmem:[#allocation2 + $0x1e0] sm:$0xff] }
  0x60   :  { %2568 = vmatmul.mubr.msk.f32.gmra.mxu0 %vm441_vm15, %v2978_v37  ;;  %2600 = vmatprep.subr.mxu0 %v2784_v1 }
  0x61   :  { %2583 = vmatprep.subr.mxu1 %v2784_v1  ;;  %2601 = vmatpush3.msk.msra.mxu0 %vm1328_vm8, %v2787_v22  ;;  %vm1652_vm8 = vcmask 392192  }
  0x62   :  { %347 = vperm.xlu1 %2704, %v78_v61   ;;  %383 = vperm.xlu0 %2703, %v84_v62   ;;  %v51_v62 = vld [vmem:[#allocation2 + $0xb0] sm:$0xff] }
  0x63   :  { %2584 = vmatpush3.msk.msra.mxu1 %vm1194_vm2, %v2787_v22  ;;  %2602 = vmatprep.subr.mxu0 %v2784_v1 }
  0x64   :  { %2570 = vmatprep.mubr.msk.f32.mxu0 %vm2785_vm0, %v2784_v1  ;;  %2585 = vmatprep.subr.mxu1 %v2784_v1 }
  0x65   :  { %2603 = vmatpush3.msk.msra.mxu0 %vm1327_vm9, %v2787_v22  ;;  %2586 = vmatpush3.msk.msra.mxu1 %vm1193_vm7, %v2787_v22  ;;  %vm2097_vm9 = vcmask 57344  }
  0x66   :  { %2571 = vmatmul.mubr.msk.f32.gmra.mxu0 %vm441_vm15, %v3004_v40  ;;  %2587 = vmatprep.mubr.msk.f32.mxu1 %vm2785_vm0, %v2784_v1 }
  0x67   :  { %2604 = vmatprep.subr.mxu0 %v2784_v1  ;;  %2588 = vmatmul.mubr.msk.f32.vlgmr.msra.gmra.mxu1 %vm441_vm15, %v2919_v33 }
  0x68   :  { %2605 = vmatpush3.msk.msra.mxu0 %vm1326_vm10, %v2787_v22  ;;  %342 = vperm.xlu1 %2704, %v77_v63   ;;  %v35_v63 = vld [vmem:[#allocation2 + $0x30] sm:$0xff] }
  0x69   :  { %378 = vperm.xlu0 %2703, %v83_v0   ;;  %2606 = vmatprep.subr.mxu0 %v2784_v1 }
  0x6a   :  { %2607 = vmatpush3.msk.msra.mxu0 %vm1325_vm11, %v2787_v22  ;;  %2590 = vmatprep.mubr.msk.f32.mxu1 %vm2785_vm0, %v2784_v1 }
  0x6b   :  { %2608 = vmatprep.subr.mxu0 %v2784_v1  ;;  %2591 = vmatmul.mubr.msk.f32.gmra.mxu1 %vm441_vm15, %v2978_v37 }
  0x6c   :  { %2609 = vmatpush3.msk.msra.mxu0 %vm1324_vm12, %v2787_v22  ;;  %2610 = vmatprep.mubr.msk.f32.mxu0 %vm2785_vm0, %v2784_v1  ;;  %v111_v22 = vld [vmem:[#allocation2 + $0x290] sm:$0xff] }
  0x6d   :  { %337 = vperm.xlu1 %2704, %v76_v3   ;;  %1848 = vperm.xlu0 %2703, %v88_v5  }
  0x6e   :  { %2611 = vmatmul.mubr.msk.f32.vlgmr.msra.gmra.mxu0 %vm441_vm15, %v2919_v33  ;;  %2593 = vmatprep.mubr.msk.f32.mxu1 %vm2785_vm0, %v2784_v1  ;;  %v118_v33 = vld [vmem:[#allocation2 + $0x2c8] sm:$0xff] }
  0x6f   :  { %2594 = vmatmul.mubr.msk.f32.gmra.mxu1 %vm441_vm15, %v3004_v40  ;;  %2613 = vmatprep.mubr.msk.f32.mxu0 %vm2785_vm0, %v2784_v1 }
  0x71   :  { %373 = vperm.xlu1 %2704, %v82_v6   ;;  %1858 = vperm.xlu0 %2703, %v90_v7  }
  0x72   :  { %2614 = vmatmul.mubr.msk.f32.gmra.mxu0 %vm441_vm15, %v2978_v37 }
  0x73   :  { %2616 = vmatprep.mubr.msk.f32.mxu0 %vm2785_vm0, %v2784_v1  ;;  %v108_v1 = vld [vmem:[#allocation2 + $0x278] sm:$0xff]  ;;  %vm275_vm0 = vcmask 64512  }
  0x75   :  { %1853 = vperm.xlu1 %2704, %v89_v2   ;;  %1868 = vperm.xlu0 %2703, %v92_v8  }
  0x76   :  { %2617 = vmatmul.mubr.msk.f32.gmra.mxu0 %vm441_vm15, %v3004_v40  ;;  %vm1458_vm15 = vcmask 130048  }
  0x77   :  { %2623 = vmatprep.mubr.msk.f32.mxu1 %vm1458_vm15, %v51_v62  ;;  %2659 = vmatprep.mubr.msk.f32.mxu0 %vm1652_vm8, %v35_v63 }
  0x79   :  { %1863 = vperm.xlu1 %2704, %v91_v9   ;;  %1960 = vperm.xlu0 %2703, %v104_v10  }
  0x7d   :  { %1873 = vperm.xlu1 %2704, %v93_v11   ;;  %1970 = vperm.xlu0 %2703, %v106_v12  }
  0x81   :  { %1965 = vperm.xlu1 %2704, %v105_v13   ;;  %1878 = vperm.xlu0 %2703, %v94_v14  }
  0x85   :  { %1975 = vperm.xlu1 %2704, %v107_v15   ;;  %1883 = vperm.xlu0 %2703, %v95_v16  }
  0x89   :  { %1980 = vperm.xlu1 %2704, %v108_v1   ;;  %1888 = vperm.xlu0 %2703, %v96_v17  }
  0x8d   :  { %1985 = vperm.xlu1 %2704, %v109_v18   ;;  %1893 = vperm.xlu0 %2703, %v97_v19   ;;  %v128_v37 = vpop.permute.xlu0 %127 }
  0x90   :  { %v138_v38 = vpop.permute.xlu1 %137 }
  0x91   :  { %1990 = vperm.xlu1 %2704, %v110_v20   ;;  %1898 = vperm.xlu0 %2703, %v98_v21  }
  0x92   :  { %v133_v39 = vpop.permute.xlu0 %132 }
  0x95   :  { %1995 = vperm.xlu1 %2704, %v111_v22   ;;  %1903 = vperm.xlu0 %2703, %v99_v23  }
  0x99   :  { %2000 = vperm.xlu1 %2704, %v112_v24   ;;  %1908 = vperm.xlu0 %2703, %v100_v25  }
  0x9d   :  { %2005 = vperm.xlu1 %2704, %v113_v26   ;;  %1913 = vperm.xlu0 %2703, %v101_v27  }
  0xa1   :  { %2010 = vperm.xlu1 %2704, %v114_v28   ;;  %1918 = vperm.xlu0 %2703, %v102_v29  }
  0xa5   :  { %2015 = vperm.xlu1 %2704, %v115_v30   ;;  %1923 = vperm.xlu0 %2703, %v103_v31  }
  0xa9   :  { %2020 = vperm.xlu1 %2704, %v116_v32   ;;  %2030 = vperm.xlu0 %2703, %v118_v33  }
  0xad   :  { %2025 = vperm.xlu1 %2704, %v117_v34   ;;  %2093 = vperm.xlu0 %2703, %v120_v35  }
  0xb1   :  { %2035 = vperm.xlu1 %2704, %v119_v36  }
  0xbc   :  { %v148_v6 = vpop.permute.xlu0 %147 }
  0xc2   :  { %v143_v45 = vpop.permute.xlu1 %142 }
  0xc8   :  { %v153_v58 = vpop.permute.xlu1 %152 }
  0xd9   :  { %v2428_v40 = vpop.f32.mrf.mxu0 }
  0xda   :  { %v246_v41 = vadd.f32 %v2428_v40, %v133_v39 }
  0xdb   :  { %v240_v42 = vpop.f32.mrf.mxu0 }
  0xdc   :  { %v3251_v43 = vmax.f32 %v246_v41, 0.0  ;;  %v241_v44 = vadd.f32 %v240_v42, %v128_v37 }
  0xde   :  { %v3253_v46 = vmax.f32 %v241_v44, 0.0  ;;  %v296_v47 = vmul.f32 %v3251_v43, %v3251_v43  ;;  %v277_v52 = vsel %vm275_vm0, %v3251_v43, 0.0 }
  0xdf   :  { %v2431_v48 = vpop.f32.mrf.mxu0 }
  0xe0   :  { %v295_v49 = vmul.f32 %v3253_v46, %v3253_v46  ;;  %v256_v50 = vadd.f32 %v2431_v48, %v143_v45  ;;  %v276_v53 = vsel %vm275_vm0, %v3253_v46, 0.0  ;;  %v302_v56 = vsel %vm275_vm0, %v296_v47, 0.0 }
  0xe1   :  { %v250_v51 = vpop.f32.mrf.mxu0  ;;  %v278_v0 = vadd.f32 %v277_v52, %v276_v53 }
  0xe2   :  { %v3263_v54 = vmax.f32 %v256_v50, 0.0  ;;  %v251_v55 = vadd.f32 %v250_v51, %v138_v38  ;;  %v301_v57 = vsel %vm275_vm0, %v295_v49, 0.0 }
  0xe3   :  { %v303_v7 = vadd.f32 %v302_v56, %v301_v57 }
  0xe4   :  { %v298_v59 = vmul.f32 %v3263_v54, %v3263_v54  ;;  %v3269_v60 = vmax.f32 %v251_v55, 0.0  ;;  %v281_v10 = vsel %vm275_vm0, %v3263_v54, 0.0 }
  0xe5   :  { %v2434_v61 = vpop.f32.mrf.mxu0 }
  0xe6   :  { %v266_v3 = vadd.f32 %v2434_v61, %v153_v58  ;;  %v3271_v5 = vpop.f32.mrf.mxu1  ;;  %v279_v2 = vsel %vm275_vm0, %v3269_v60, 0.0  ;;  %v297_v8 = vmul.f32 %v3269_v60, %v3269_v60  ;;  %v306_v15 = vsel %vm275_vm0, %v298_v59, 0.0 }
  0xe7   :  { %v260_v9 = vpop.f32.mrf.mxu0  ;;  %v280_v11 = vadd.f32 %v279_v2, %v278_v0  ;;  %v363_v0 = vpop.permute.xlu0 %362 }
  0xe8   :  { %v3281_v12 = vmax.f32 %v266_v3, 0.0  ;;  %v261_v13 = vadd.f32 %v260_v9, %v148_v6  ;;  %v2451_v14 = vpop.f32.mrf.mxu1  ;;  %v304_v16 = vsel %vm275_vm0, %v297_v8, 0.0  ;;  %v358_v2 = vpop.permute.xlu1 %357 }
  0xe9   :  { %v305_v1 = vadd.f32 %v304_v16, %v303_v7  ;;  %v282_v19 = vadd.f32 %v281_v10, %v280_v11 }
  0xea   :  { %v300_v17 = vmul.f32 %v3281_v12, %v3281_v12  ;;  %v3287_v18 = vmax.f32 %v261_v13, 0.0  ;;  %v285_v20 = vsel %vm275_vm0, %v3281_v12, 0.0 }
  0xeb   :  { %v307_v23 = vadd.f32 %v306_v15, %v305_v1  ;;  %v399_v14 = vpop.permute.xlu0 %398 }
  0xec   :  { %v283_v21 = vsel %vm275_vm0, %v3287_v18, 0.0  ;;  %v299_v22 = vmul.f32 %v3287_v18, %v3287_v18  ;;  %v3295_v24 = vpop.f32.mrf.mxu0  ;;  %v310_v26 = vsel %vm275_vm0, %v300_v17, 0.0  ;;  %v353_v16 = vpop.permute.xlu1 %352 }
  0xed   :  { %v284_v25 = vadd.f32 %v283_v21, %v282_v19 }
  0xee   :  { %v308_v27 = vsel %vm275_vm0, %v299_v22, 0.0  ;;  %v3299_v28 = vpop.f32.mrf.mxu1  ;;  %v2474_v29 = vpop.f32.mrf.mxu0 }
  0xef   :  { %v286_v30 = vadd.f32 %v285_v20, %v284_v25  ;;  %v309_v31 = vadd.f32 %v308_v27, %v307_v23  ;;  %v394_v22 = vpop.permute.xlu0 %393 }
  0xf0   :  { %v2454_v32 = vpop.f32.mrf.mxu1 }
  0xf1   :  { %v287_v33 = vrot.slane %v286_v30, 4  ;;  %v311_v34 = vadd.f32 %v310_v26, %v309_v31 }
  0xf2   :  { %v634_v35 = vpop.f32.mrf.mxu0 }
  0xf3   :  { %v288_v36 = vadd.f32 %v287_v33, %v286_v30  ;;  %v312_v37 = vrot.slane %v311_v34, 4  ;;  %v348_v30 = vpop.permute.xlu1 %347 }
  0xf4   :  { %v531_v38 = vpop.f32.mrf.mxu1  ;;  %v2477_v39 = vpop.f32.mrf.mxu0 }
  0xf5   :  { %v289_v40 = vrot.slane %v288_v36, 2  ;;  %v313_v41 = vadd.f32 %v312_v37, %v311_v34 }
  0xf6   :  { %v2457_v42 = vpop.f32.mrf.mxu1 }
  0xf7   :  { %v290_v44 = vadd.f32 %v289_v40, %v288_v36  ;;  %v314_v45 = vrot.slane %v313_v41, 2  ;;  %v389_v40 = vpop.permute.xlu0 %388 }
  0xf8   :  { %v639_v47 = vpop.f32.mrf.mxu0 }
  0xf9   :  { %v291_v48 = vrot.slane %v290_v44, 1  ;;  %v315_v49 = vadd.f32 %v314_v45, %v313_v41  ;;  %v643_v50 = vmax.f32 %v531_v38, %v639_v47 }
  0xfa   :  { %v3301_v51 = vpop.f32.mrf.mxu1  ;;  %v2480_v52 = vpop.f32.mrf.mxu0 }
  0xfb   :  { %v292_v53 = vadd.f32 %v291_v48, %v290_v44  ;;  %v316_v55 = vrot.slane %v315_v49, 1  ;;  %v644_v56 = vsub.f32 %v531_v38, %v643_v50  ;;  %v647_v57 = vsub.f32 %v639_v47, %v643_v50 }
  0xfc   :  { %v2497_v58 = vpop.f32.mrf.mxu1 }
  0xfd   :  { %v3303_v59 = vmul.f32 0.020833334, %v292_v53  ;;  %v317_v61 = vadd.f32 %v316_v55, %v315_v49  ;;  %v645_v62 = vmul.f32 1.442695, %v644_v56  ;;  %v648_v63 = vmul.f32 1.442695, %v647_v57  ;;  %v343_v49 = vpop.permute.xlu1 %342 }
  0xff   :  { %v318_v3 = vmul.f32 0.020833334, %v317_v61  ;;  %v319_v6 = vmul.f32 %v3303_v59, %v3303_v59  ;;  %2705 = vpow2.f32 %v645_v62  ;;  %v3307_v7 = vpop.f32.mrf.mxu1  ;;  %v325_v41 = vsub.f32 %v3287_v18, %v3303_v59 }
 0x100   :  { %2707 = vpow2.f32 %v648_v63  ;;  %v326_v42 = vsub.f32 %v3281_v12, %v3303_v59  ;;  %v324_v44 = vsub.f32 %v3263_v54, %v3303_v59  ;;  %v323_v12 = vsub.f32 %v3269_v60, %v3303_v59 }
 0x101   :  { %v320_v8 = vsub.f32 %v318_v3, %v319_v6  ;;  %v3309_v9 = vpop.f32.mrf.mxu0  ;;  %v2500_v10 = vpop.f32.mrf.mxu1  ;;  %v322_v61 = vsub.f32 %v3251_v43, %v3303_v59  ;;  %v321_v62 = vsub.f32 %v3253_v46, %v3303_v59 }
 0x102   :  { %v338_v10 = vpop.permute.xlu1 %337 }
 0x103   :  { %v327_v11 = vadd.f32 1e-05, %v320_v8  ;;  %v2520_v13 = vpop.f32.mrf.mxu0  ;;  %v384_v8 = vpop.permute.xlu0 %383 }
 0x105   :  { %2709 = vrsqrt.f32 %v327_v11  ;;  %v769_v15 = vpop.f32.mrf.mxu1 }
 0x106   :  { %v773_v1 = vmax.f32 %v643_v50, %v769_v15 }
 0x107   :  { %v2503_v17 = vpop.f32.mrf.mxu1 }
 0x108   :  { %v774_v19 = vsub.f32 %v643_v50, %v773_v1  ;;  %v777_v20 = vsub.f32 %v769_v15, %v773_v1  ;;  %v3311_v21 = vpop.f32.mrf.mxu0 }
 0x10a   :  { %v775_v23 = vmul.f32 1.442695, %v774_v19  ;;  %v778_v25 = vmul.f32 1.442695, %v777_v20  ;;  %v2523_v27 = vpop.f32.mrf.mxu0 }
 0x10c   :  { %v3313_v26 = vpop.eup %2705  ;;  %2711 = vpow2.f32 %v775_v23 }
 0x10d   :  { %v3315_v29 = vpop.eup %2707  ;;  %v654_v31 = vrot.slane %v3313_v26, %v2818_v4  ;;  %2713 = vpow2.f32 %v778_v25  ;;  %v379_v25 = vpop.permute.xlu0 %378 }
 0x10e   :  { %v660_v32 = vrot.slane %v3315_v29, %v2818_v4  ;;  %v900_v36 = vpop.f32.mrf.mxu0 }
 0x10f   :  { %v655_v33 = vmul.f32 %v654_v31, %v3271_v5  ;;  %v656_v34 = vmul.f32 %v654_v31, %v3299_v28  ;;  %v3324_v39 = vmax.f32 %v773_v1, %v900_v36 }
 0x110   :  { %v661_v37 = vmul.f32 %v660_v32, %v3295_v24  ;;  %v662_v38 = vmul.f32 %v660_v32, %v634_v35  ;;  %v3334_v35 = vpop.f32.mrf.mxu1  ;;  %v2526_v48 = vpop.f32.mrf.mxu0 }
 0x111   :  { %v905_v28 = vsub.f32 %v773_v1, %v3324_v39  ;;  %v908_v24 = vsub.f32 %v900_v36, %v3324_v39 }
 0x112   :  { %v2710_v45 = vpop.eup %2709  ;;  %v663_v5 = vadd.f32 %v661_v37, %v655_v33  ;;  %v664_v47 = vadd.f32 %v662_v38, %v656_v34  ;;  %v2543_v54 = vpop.f32.mrf.mxu1 }
 0x113   :  { %v333_v50 = vmul.f32 %v2710_v45, %v325_v41  ;;  %v334_v52 = vmul.f32 %v2710_v45, %v326_v42  ;;  %v332_v18 = vmul.f32 %v2710_v45, %v324_v44  ;;  %v906_v53 = vmul.f32 1.442695, %v905_v28  ;;  %v374_v34 = vpop.permute.xlu1 %373  ;;  %v36_v41 = vld [vmem:[#allocation2 + $0x38] sm:$0xff] }
 0x114   :  { %v909_v55 = vmul.f32 1.442695, %v908_v24  ;;  %v331_v58 = vmul.f32 %v2710_v45, %v323_v12  ;;  %v330_v6 = vmul.f32 %v2710_v45, %v322_v61  ;;  %v329_v11 = vmul.f32 %v2710_v45, %v321_v62  ;;  %v37_v45 = vld [vmem:[#allocation2 + $0x40] sm:$0xff] }
 0x115   :  { %v370_v56 = vmul.f32 %v363_v0, %v334_v52  ;;  %v369_v57 = vmul.f32 %v358_v2, %v333_v50  ;;  %2715 = vpow2.f32 %v906_v53  ;;  %v368_v3 = vmul.f32 %v353_v16, %v332_v18  ;;  %v38_v50 = vld [vmem:[#allocation2 + $0x48] sm:$0xff] }
 0x116   :  { %2717 = vpow2.f32 %v909_v55  ;;  %v367_v2 = vmul.f32 %v348_v30, %v331_v58  ;;  %v366_v16 = vmul.f32 %v343_v49, %v330_v6  ;;  %v365_v23 = vmul.f32 %v338_v10, %v329_v11  ;;  %v39_v55 = vld [vmem:[#allocation2 + $0x50] sm:$0xff] }
 0x117   :  { %v3342_v63 = vadd.f32 %v399_v14, %v370_v56  ;;  %v3344_v60 = vpop.f32.mrf.mxu1  ;;  %v3347_v0 = vadd.f32 %v394_v22, %v369_v57  ;;  %v3356_v14 = vadd.f32 %v389_v40, %v368_v3  ;;  %v650_v52 = vadd.f32 %v3315_v29, %v3313_v26 }
 0x118   :  { %v3349_v13 = vpop.f32.mrf.mxu0  ;;  %v3362_v22 = vadd.f32 %v384_v8, %v367_v2  ;;  %v3369_v33 = vadd.f32 %v379_v25, %v366_v16 }
 0x119   :  { %2647 = vmatprep.subr.mxu0 %v3342_v63  ;;  %v2712_v43 = vpop.eup %2711  ;;  %v2546_v15 = vpop.f32.mrf.mxu1 }
 0x11a   :  { %2648 = vmatpush3.msra.mxu0 %v3342_v63  ;;  %v3352_v46 = vpop.eup %2713  ;;  %v785_v59 = vrot.slane %v2712_v43, %v2818_v4  ;;  %v2566_v17 = vpop.f32.mrf.mxu0  ;;  %v780_v57 = vmul.f32 %v2712_v43, %v650_v52  ;;  %v42_v43 = vld [vmem:[#allocation2 + $0x68] sm:$0xff] }
 0x11b   :  { %2649 = vmatprep.subr.mxu0 %v3347_v0  ;;  %v791_v1 = vrot.slane %v3352_v46, %v2818_v4 }
 0x11c   :  { %2650 = vmatpush3.msra.mxu0 %v3347_v0  ;;  %v786_v19 = vmul.f32 %v785_v59, %v663_v5  ;;  %v787_v20 = vmul.f32 %v785_v59, %v664_v47  ;;  %v781_v10 = vadd.f32 %v3352_v46, %v780_v57  ;;  %v43_v59 = vld [vmem:[#allocation2 + $0x70] sm:$0xff] }
 0x11d   :  { %2651 = vmatprep.subr.mxu0 %v3356_v14  ;;  %v792_v27 = vmul.f32 %v791_v1, %v3301_v51  ;;  %v793_v30 = vmul.f32 %v791_v1, %v3307_v7  ;;  %v1031_v31 = vpop.f32.mrf.mxu1  ;;  %v3374_v51 = vadd.f32 %v374_v34, %v365_v23  ;;  %v44_v23 = vld [vmem:[#allocation2 + $0x78] sm:$0xff] }
 0x11e   :  { %2652 = vmatpush3.msra.mxu0 %v3356_v14  ;;  %v1035_v32 = vmax.f32 %v3324_v39, %v1031_v31 }
 0x11f   :  { %2653 = vmatprep.subr.mxu0 %v3362_v22  ;;  %v794_v36 = vadd.f32 %v792_v27, %v786_v19  ;;  %v795_v37 = vadd.f32 %v793_v30, %v787_v20  ;;  %v2549_v38 = vpop.f32.mrf.mxu1 }
 0x120   :  { %2654 = vmatpush3.msra.mxu0 %v3362_v22  ;;  %v1036_v40 = vsub.f32 %v3324_v39, %v1035_v32  ;;  %v3376_v7 = vpop.f32.mrf.mxu0  ;;  %v1039_v24 = vsub.f32 %v1031_v31, %v1035_v32  ;;  %v45_v31 = vld [vmem:[#allocation2 + $0x80] sm:$0xff] }
 0x121   :  { %2655 = vmatprep.subr.mxu0 %v3369_v33 }
 0x122   :  { %2656 = vmatpush3.msra.mxu0 %v3369_v33  ;;  %v2716_v42 = vpop.eup %2715  ;;  %v1037_v44 = vmul.f32 1.442695, %v1036_v40  ;;  %v2569_v28 = vpop.f32.mrf.mxu0  ;;  %v1040_v62 = vmul.f32 1.442695, %v1039_v24  ;;  %v46_v40 = vld [vmem:[#allocation2 + $0x88] sm:$0xff]  ;;  %v48_v24 = vld [vmem:[#allocation2 + $0x98] sm:$0xff] }
 0x123   :  { %2657 = vmatprep.subr.mxu0 %v3374_v51  ;;  %v2718_v5 = vpop.eup %2717  ;;  %v916_v47 = vrot.slane %v2716_v42, %v2818_v4  ;;  %v911_v1 = vmul.f32 %v2716_v42, %v781_v10 }
 0x124   :  { %2658 = vmatpush3.msra.mxu0 %v3374_v51  ;;  %v922_v39 = vrot.slane %v2718_v5, %v2818_v4  ;;  %2719 = vpow2.f32 %v1037_v44  ;;  %v47_v44 = vld [vmem:[#allocation2 + $0x90] sm:$0xff] }
 0x125   :  { %2660 = vmatmul.mubr.msk.f32.vlgmr.msra.gmra.mxu0 %vm1652_vm8, %v36_v41  ;;  %v917_v48 = vmul.f32 %v916_v47, %v794_v36  ;;  %v918_v49 = vmul.f32 %v916_v47, %v795_v37  ;;  %2721 = vpow2.f32 %v1040_v62  ;;  %v912_v34 = vadd.f32 %v2718_v5, %v911_v1 }
 0x126   :  { %2662 = vmatprep.mubr.msk.f32.mxu0 %vm1652_vm8, %v37_v45  ;;  %v923_v18 = vmul.f32 %v922_v39, %v3309_v9  ;;  %v924_v12 = vmul.f32 %v922_v39, %v3311_v21  ;;  %v1162_v53 = vpop.f32.mrf.mxu0  ;;  %v40_v9 = vld [vmem:[#allocation2 + $0x58] sm:$0xff]  ;;  %v41_v21 = vld [vmem:[#allocation2 + $0x60] sm:$0xff] }
 0x127   :  { %v1166_v54 = vmax.f32 %v1035_v32, %v1162_v53  ;;  %v3389_v56 = vpop.f32.mrf.mxu1 }
 0x128   :  { %v3391_v58 = vadd.f32 %v923_v18, %v917_v48  ;;  %v3393_v61 = vadd.f32 %v924_v12, %v918_v49  ;;  %v2572_v26 = vpop.f32.mrf.mxu0 }
 0x129   :  { %2663 = vmatmul.mubr.msk.f32.gmra.mxu0 %vm1652_vm8, %v38_v50  ;;  %v1167_v3 = vsub.f32 %v1035_v32, %v1166_v54  ;;  %v2589_v29 = vpop.f32.mrf.mxu1  ;;  %v1170_v2 = vsub.f32 %v1162_v53, %v1166_v54 }
 0x12a   :  { %2665 = vmatprep.mubr.msk.f32.mxu0 %vm1652_vm8, %v39_v55 }
 0x12b   :  { %v1168_v6 = vmul.f32 1.442695, %v1167_v3  ;;  %v3397_v8 = vpop.f32.mrf.mxu1  ;;  %v1171_v17 = vmul.f32 1.442695, %v1170_v2 }
 0x12d   :  { %2666 = vmatmul.mubr.msk.f32.gmra.mxu0 %vm1652_vm8, %v40_v9  ;;  %v2592_v11 = vpop.f32.mrf.mxu1  ;;  %2723 = vpow2.f32 %v1168_v6 }
 0x12e   :  { %2668 = vmatprep.mubr.msk.f32.mxu0 %vm1652_vm8, %v41_v21  ;;  %v3402_v15 = vpop.f32.mrf.mxu0  ;;  %2725 = vpow2.f32 %v1171_v17 }
 0x12f   :  { %v1293_v16 = vpop.f32.mrf.mxu1 }
 0x130   :  { %v2612_v19 = vpop.f32.mrf.mxu0  ;;  %v1297_v20 = vmax.f32 %v1166_v54, %v1293_v16 }
 0x131   :  { %2669 = vmatmul.mubr.msk.f32.gmra.mxu0 %vm1652_vm8, %v42_v43  ;;  %v2595_v46 = vpop.f32.mrf.mxu1  ;;  %v2720_v32 = vpop.eup %2719 }
 0x132   :  { %2671 = vmatprep.mubr.msk.f32.mxu0 %vm1652_vm8, %v43_v59  ;;  %v1298_v25 = vsub.f32 %v1166_v54, %v1297_v20  ;;  %v1301_v27 = vsub.f32 %v1293_v16, %v1297_v20  ;;  %v3406_v30 = vpop.f32.mrf.mxu0  ;;  %v1042_v41 = vmul.f32 %v2720_v32, %v912_v34  ;;  %v2722_v28 = vpop.eup %2721  ;;  %v1047_v53 = vrot.slane %v2720_v32, %v2818_v4 }
 0x133   :  { %v1053_v12 = vrot.slane %v2722_v28, %v2818_v4 }
 0x134   :  { %v1299_v36 = vmul.f32 1.442695, %v1298_v25  ;;  %v2615_v37 = vpop.f32.mrf.mxu0  ;;  %v1302_v38 = vmul.f32 1.442695, %v1301_v27  ;;  %v1043_v48 = vadd.f32 %v2722_v28, %v1042_v41  ;;  %v1049_v3 = vmul.f32 %v1047_v53, %v3393_v61 }
 0x135   :  { %2672 = vmatmul.mubr.msk.f32.gmra.mxu0 %vm1652_vm8, %v44_v23  ;;  %v1055_v62 = vmul.f32 %v1053_v12, %v3344_v60  ;;  %v1054_v26 = vmul.f32 %v1053_v12, %v3334_v35  ;;  %v1048_v9 = vmul.f32 %v1047_v53, %v3391_v58  ;;  %v1854_v12 = vpop.permute.xlu1 %1853 }
 0x136   :  { %2674 = vmatprep.mubr.msk.f32.mxu0 %vm1652_vm8, %v45_v31  ;;  %2727 = vpow2.f32 %v1299_v36  ;;  %v1424_v42 = vpop.f32.mrf.mxu0 }
 0x137   :  { %v1428_v45 = vmax.f32 %v1297_v20, %v1424_v42  ;;  %2729 = vpow2.f32 %v1302_v38  ;;  %v1057_v2 = vadd.f32 %v1055_v62, %v1049_v3  ;;  %v1056_v43 = vadd.f32 %v1054_v26, %v1048_v9 }
 0x138   :  { %v2618_v47 = vpop.f32.mrf.mxu0 }
 0x139   :  { %2675 = vmatmul.mubr.msk.f32.gmra.mxu0 %vm1652_vm8, %v46_v40  ;;  %v1429_v5 = vsub.f32 %v1297_v20, %v1428_v45  ;;  %v1432_v39 = vsub.f32 %v1424_v42, %v1428_v45 }
 0x13a   :  { %2677 = vmatprep.mubr.msk.f32.mxu0 %vm1652_vm8, %v47_v44  ;;  %v2724_v49 = vpop.eup %2723 }
 0x13b   :  { %v1430_v50 = vmul.f32 1.442695, %v1429_v5  ;;  %v1433_v52 = vmul.f32 1.442695, %v1432_v39  ;;  %v1173_v18 = vmul.f32 %v2724_v49, %v1043_v48  ;;  %v2726_v55 = vpop.eup %2725  ;;  %v1178_v11 = vrot.slane %v2724_v49, %v2818_v4  ;;  %v53_v5 = vld [vmem:[#allocation2 + $0xc0] sm:$0xff]  ;;  %v60_v39 = vld [vmem:[#allocation2 + $0xf8] sm:$0xff] }
 0x13c   :  { %v1184_v6 = vrot.slane %v2726_v55, %v2818_v4  ;;  %v64_v48 = vld [vmem:[#allocation2 + $0x118] sm:$0xff]  ;;  %v65_v49 = vld [vmem:[#allocation2 + $0x120] sm:$0xff] }
 0x13d   :  { %2678 = vmatmul.mubr.msk.f32.gmra.mxu0 %vm1652_vm8, %v48_v24  ;;  %2731 = vpow2.f32 %v1430_v50  ;;  %v1174_v54 = vadd.f32 %v2726_v55, %v1173_v18  ;;  %v1180_v1 = vmul.f32 %v1178_v11, %v1057_v2  ;;  %v1179_v61 = vmul.f32 %v1178_v11, %v1056_v43  ;;  %v62_v24 = vld [vmem:[#allocation2 + $0x108] sm:$0xff]  ;;  %v49_v50 = vld [vmem:[#allocation2 + $0xa0] sm:$0xff]  ;;  %v1849_v18 = vpop.permute.xlu0 %1848  ;;  %v1864_v55 = vpop.permute.xlu1 %1863 }
 0x13e   :  { %2733 = vpow2.f32 %v1433_v52  ;;  %v1186_v60 = vmul.f32 %v1184_v6, %v3376_v7  ;;  %v1185_v20 = vmul.f32 %v1184_v6, %v3349_v13  ;;  %v50_v52 = vld [vmem:[#allocation2 + $0xa8] sm:$0xff] }
 0x140   :  { %v1188_v46 = vadd.f32 %v1186_v60, %v1180_v1  ;;  %v1187_v31 = vadd.f32 %v1185_v20, %v1179_v61 }
 0x141   :  { %v1859_v53 = vpop.permute.xlu0 %1858 }
 0x143   :  { %v2728_v57 = vpop.eup %2727 }
 0x144   :  { %v1304_v29 = vmul.f32 %v2728_v57, %v1174_v54  ;;  %v2730_v21 = vpop.eup %2729  ;;  %v1309_v35 = vrot.slane %v2728_v57, %v2818_v4  ;;  %v1874_v57 = vpop.permute.xlu1 %1873 }
 0x145   :  { %v1315_v58 = vrot.slane %v2730_v21, %v2818_v4  ;;  %v1869_v54 = vpop.permute.xlu0 %1868 }
 0x146   :  { %v1305_v10 = vadd.f32 %v2730_v21, %v1304_v29  ;;  %v1311_v25 = vmul.f32 %v1309_v35, %v1188_v46  ;;  %v1310_v32 = vmul.f32 %v1309_v35, %v1187_v31 }
 0x147   :  { %v1317_v27 = vmul.f32 %v1315_v58, %v3397_v8  ;;  %v1316_v7 = vmul.f32 %v1315_v58, %v3389_v56  ;;  %v52_v56 = vld [vmem:[#allocation2 + $0xb8] sm:$0xff] }
 0x148   :  { %v1966_v3 = vpop.permute.xlu1 %1965 }
 0x149   :  { %v1319_v34 = vadd.f32 %v1317_v27, %v1311_v25  ;;  %v1318_v38 = vadd.f32 %v1316_v7, %v1310_v32  ;;  %v1961_v62 = vpop.permute.xlu0 %1960 }
 0x14a   :  { %v2732_v59 = vpop.eup %2731 }
 0x14b   :  { %v1435_v16 = vmul.f32 %v2732_v59, %v1305_v10  ;;  %v2734_v17 = vpop.eup %2733  ;;  %v1440_v36 = vrot.slane %v2732_v59, %v2818_v4 }
 0x14c   :  { %v1446_v37 = vrot.slane %v2734_v17, %v2818_v4  ;;  %v1976_v9 = vpop.permute.xlu1 %1975 }
 0x14d   :  { %v1436_v19 = vadd.f32 %v2734_v17, %v1435_v16  ;;  %v1442_v40 = vmul.f32 %v1440_v36, %v1319_v34  ;;  %v1441_v41 = vmul.f32 %v1440_v36, %v1318_v38  ;;  %v1971_v29 = vpop.permute.xlu0 %1970 }
 0x14e   :  { %v1448_v13 = vmul.f32 %v1446_v37, %v3406_v30  ;;  %v1447_v42 = vmul.f32 %v1446_v37, %v3402_v15  ;;  %v55_v15 = vld [vmem:[#allocation2 + $0xd0] sm:$0xff]  ;;  %v56_v30 = vld [vmem:[#allocation2 + $0xd8] sm:$0xff] }
 0x14f   :  { %v1454_v23 = vrot.slane %v1436_v19, %v2818_v4  ;;  %v54_v4 = vld [vmem:[#allocation2 + $0xc8] sm:$0xff] }
 0x150   :  { %v1450_v44 = vadd.f32 %v1448_v13, %v1442_v40  ;;  %v1449_v47 = vadd.f32 %v1447_v42, %v1441_v41  ;;  %v3463_v10 = vpop.permute.xlu1 %1980 }
 0x151   :  { %2735 = vrcp.f32 %v1454_v23  ;;  %v3461_v6 = vpop.permute.xlu0 %1878 }
 0x154   :  { %v1986_v59 = vpop.permute.xlu1 %1985 }
 0x155   :  { %v1884_v43 = vpop.permute.xlu0 %1883 }
 0x158   :  { %v3467_v60 = vpop.permute.xlu1 %1990 }
 0x159   :  { %v3465_v1 = vpop.permute.xlu0 %1888 }
 0x15c   :  { %v3469_v35 = vpop.permute.xlu1 %1995 }
 0x15d   :  { %v1894_v19 = vpop.permute.xlu0 %1893 }
 0x15e   :  { %v2736_v45 = vpop.eup %2735 }
 0x15f   :  { %v1457_v8 = vmul.f32 %v2736_v45, %v1450_v44  ;;  %v1456_v28 = vmul.f32 %v2736_v45, %v1449_v47 }
 0x160   :  { %v3473_v27 = vpop.permute.xlu1 %2000 }
 0x161   :  { %2619 = vmatprep.subr.mxu1 %v1457_v8  ;;  %v3471_v25 = vpop.permute.xlu0 %1898 }
 0x162   :  { %2620 = vmatpush3.msra.mxu1 %v1457_v8 }
 0x163   :  { %2621 = vmatprep.subr.mxu1 %v1456_v28 }
 0x164   :  { %2622 = vmatpush3.msra.mxu1 %v1456_v28  ;;  %v3475_v47 = vpop.permute.xlu1 %2005 }
 0x165   :  { %2624 = vmatmul.mubr.msk.f32.vlgmr.msra.gmra.mxu1 %vm1458_vm15, %v52_v56  ;;  %2683 = vmatprep.subr.mxu1 %v3342_v63  ;;  %v1904_v8 = vpop.permute.xlu0 %1903 }
 0x166   :  { %2689 = vmatpush3.msra.mxu1 %v3342_v63  ;;  %2626 = vmatprep.mubr.msk.f32.mxu1 %vm1458_vm15, %v53_v5  ;;  %v57_v63 = vld [vmem:[#allocation2 + $0xe0] sm:$0xff] }
 0x167   :  { %2684 = vmatprep.subr.mxu1 %v3347_v0 }
 0x168   :  { %2690 = vmatpush3.msra.mxu1 %v3347_v0  ;;  %v58_v0 = vld [vmem:[#allocation2 + $0xe8] sm:$0xff] }
 0x169   :  { %2627 = vmatmul.mubr.msk.f32.gmra.mxu1 %vm1458_vm15, %v54_v4  ;;  %2685 = vmatprep.subr.mxu1 %v3356_v14 }
 0x16a   :  { %2691 = vmatpush3.msra.mxu1 %v3356_v14  ;;  %2629 = vmatprep.mubr.msk.f32.mxu1 %vm1458_vm15, %v55_v15  ;;  %v59_v14 = vld [vmem:[#allocation2 + $0xf0] sm:$0xff] }
 0x16b   :  { %2686 = vmatprep.subr.mxu1 %v3362_v22 }
 0x16c   :  { %2692 = vmatpush3.msra.mxu1 %v3362_v22  ;;  %v61_v22 = vld [vmem:[#allocation2 + $0x100] sm:$0xff] }
 0x16d   :  { %2630 = vmatmul.mubr.msk.f32.gmra.mxu1 %vm1458_vm15, %v56_v30  ;;  %2687 = vmatprep.subr.mxu1 %v3369_v33 }
 0x16e   :  { %2693 = vmatpush3.msra.mxu1 %v3369_v33  ;;  %2632 = vmatprep.mubr.msk.f32.mxu1 %vm1458_vm15, %v57_v63  ;;  %v63_v33 = vld [vmem:[#allocation2 + $0x110] sm:$0xff] }
 0x16f   :  { %2688 = vmatprep.subr.mxu1 %v3374_v51 }
 0x170   :  { %2694 = vmatpush3.msra.mxu1 %v3374_v51  ;;  %v66_v51 = vld [vmem:[#allocation2 + $0x128] sm:$0xff] }
 0x171   :  { %2633 = vmatmul.mubr.msk.f32.gmra.mxu1 %vm1458_vm15, %v58_v0 }
 0x172   :  { %2635 = vmatprep.mubr.msk.f32.mxu1 %vm1458_vm15, %v59_v14 }
 0x175   :  { %2636 = vmatmul.mubr.msk.f32.gmra.mxu1 %vm1458_vm15, %v60_v39 }
 0x176   :  { %2638 = vmatprep.mubr.msk.f32.mxu1 %vm1458_vm15, %v61_v22 }
 0x179   :  { %2639 = vmatmul.mubr.msk.f32.gmra.mxu1 %vm1458_vm15, %v62_v24 }
 0x17a   :  { %2641 = vmatprep.mubr.msk.f32.mxu1 %vm1458_vm15, %v63_v33 }
 0x17d   :  { %2642 = vmatmul.mubr.msk.f32.gmra.mxu1 %vm1458_vm15, %v64_v48 }
 0x17e   :  { %2644 = vmatprep.mubr.msk.f32.mxu1 %vm1458_vm15, %v65_v49 }
 0x181   :  { %2645 = vmatmul.mubr.msk.f32.gmra.mxu1 %vm1458_vm15, %v66_v51 }
 0x182   :  { %2680 = vmatprep.mubr.msk.f32.mxu1 %vm1652_vm8, %v49_v50 }
 0x185   :  { %2681 = vmatmul.mubr.msk.f32.vlgmr.msra.gmra.mxu1 %vm1652_vm8, %v50_v52 }
 0x1e5   :  { %v2661_v26 = vpop.f32.mrf.mxu0 }
 0x1e7   :  { %v1767_v21 = vpop.f32.mrf.mxu0 }
 0x1e9   :  { %v2664_v2 = vpop.f32.mrf.mxu0 }
 0x1eb   :  { %v1777_v11 = vpop.f32.mrf.mxu0 }
 0x1ed   :  { %v2667_v16 = vpop.f32.mrf.mxu0 }
 0x1ef   :  { %v1787_v17 = vpop.f32.mrf.mxu0 }
 0x1f1   :  { %v2670_v61 = vpop.f32.mrf.mxu0 }
 0x1f3   :  { %v1797_v20 = vpop.f32.mrf.mxu0 }
 0x1f5   :  { %v2673_v34 = vpop.f32.mrf.mxu0 }
 0x1f7   :  { %v1807_v45 = vpop.f32.mrf.mxu0 }
 0x1f9   :  { %v2676_v33 = vpop.f32.mrf.mxu0 }
 0x225   :  { %v2625_v58 = vpop.f32.mrf.mxu1 }
 0x226   :  { %v1773_v46 = vadd.f32 %v2661_v26, %v2625_v58 }
 0x227   :  { %v1573_v23 = vpop.f32.mrf.mxu1 }
 0x228   :  { %v1927_v31 = vadd.f32 %v1854_v12, %v1773_v46  ;;  %v1768_v32 = vadd.f32 %v1767_v21, %v1573_v23 }
 0x229   :  { %v2628_v7 = vpop.f32.mrf.mxu1 }
 0x22a   :  { %v1943_v36 = vmax.f32 %v1927_v31, 0.0  ;;  %v1926_v37 = vadd.f32 %v1849_v18, %v1768_v32  ;;  %v1783_v38 = vadd.f32 %v2664_v2, %v2628_v7 }
 0x22b   :  { %v1583_v40 = vpop.f32.mrf.mxu1 }
 0x22c   :  { %v1942_v13 = vmax.f32 %v1926_v37, 0.0  ;;  %v1929_v41 = vadd.f32 %v1864_v55, %v1783_v38  ;;  %v1778_v42 = vadd.f32 %v1777_v11, %v1583_v40  ;;  %v2039_v28 = vmul.f32 %v1966_v3, %v1943_v36  ;;  %v1909_v55 = vpop.permute.xlu0 %1908 }
 0x22d   :  { %v2631_v44 = vpop.f32.mrf.mxu1 }
 0x22e   :  { %v2038_v56 = vmul.f32 %v1961_v62, %v1942_v13  ;;  %v1945_v5 = vmax.f32 %v1929_v41, 0.0  ;;  %v1928_v4 = vadd.f32 %v1859_v53, %v1778_v42  ;;  %v1793_v15 = vadd.f32 %v2667_v16, %v2631_v44  ;;  %v2011_v53 = vpop.permute.xlu1 %2010  ;;  %v1817_v16 = vpop.f32.mrf.mxu0 }
 0x22f   :  { %v1593_v30 = vpop.f32.mrf.mxu1  ;;  %v2055_v48 = vsel %vm275_vm0, %v2039_v28, 0.0 }
 0x230   :  { %v2054_v63 = vsel %vm275_vm0, %v2038_v56, 0.0  ;;  %v1944_v0 = vmax.f32 %v1928_v4, 0.0  ;;  %v1788_v14 = vadd.f32 %v1787_v17, %v1593_v30  ;;  %v2041_v39 = vmul.f32 %v1976_v9, %v1945_v5  ;;  %v2679_v36 = vpop.f32.mrf.mxu0  ;;  %v1914_v37 = vpop.permute.xlu0 %1913 }
 0x231   :  { %v1931_v22 = vadd.f32 %v1874_v57, %v1793_v15  ;;  %v2634_v24 = vpop.f32.mrf.mxu1  ;;  %v2056_v52 = vadd.f32 %v2055_v48, %v2054_v63 }
 0x232   :  { %v2040_v49 = vmul.f32 %v1971_v29, %v1944_v0  ;;  %v1930_v51 = vadd.f32 %v1869_v54, %v1788_v14  ;;  %v1803_v50 = vadd.f32 %v2670_v61, %v2634_v24  ;;  %v2059_v9 = vsel %vm275_vm0, %v2041_v39, 0.0  ;;  %v1827_v4 = vpop.f32.mrf.mxu0 }
 0x233   :  { %v1947_v18 = vmax.f32 %v1931_v22, 0.0  ;;  %v1603_v12 = vpop.f32.mrf.mxu1 }
 0x234   :  { %v2057_v62 = vsel %vm275_vm0, %v2040_v49, 0.0  ;;  %v1946_v3 = vmax.f32 %v1930_v51, 0.0  ;;  %v1933_v26 = vadd.f32 %v1884_v43, %v1803_v50  ;;  %v1798_v21 = vadd.f32 %v1797_v20, %v1603_v12  ;;  %v1919_v39 = vpop.permute.xlu0 %1918 }
 0x235   :  { %v2058_v57 = vadd.f32 %v2057_v62, %v2056_v52  ;;  %v2043_v2 = vmul.f32 %v1986_v59, %v1947_v18  ;;  %v2637_v11 = vpop.f32.mrf.mxu1 }
 0x236   :  { %v2042_v29 = vmul.f32 %v3463_v10, %v1946_v3  ;;  %v1949_v54 = vmax.f32 %v1933_v26, 0.0  ;;  %v1932_v17 = vadd.f32 %v3461_v6, %v1798_v21  ;;  %v1813_v61 = vadd.f32 %v2673_v34, %v2637_v11  ;;  %v2016_v6 = vpop.permute.xlu1 %2015 }
 0x237   :  { %v2060_v58 = vadd.f32 %v2059_v9, %v2058_v57  ;;  %v1613_v46 = vpop.f32.mrf.mxu1  ;;  %v2063_v59 = vsel %vm275_vm0, %v2043_v2, 0.0 }
 0x238   :  { %v2061_v23 = vsel %vm275_vm0, %v2042_v29, 0.0  ;;  %v1948_v31 = vmax.f32 %v1932_v17, 0.0  ;;  %v1935_v32 = vadd.f32 %v1894_v19, %v1813_v61  ;;  %v1808_v20 = vadd.f32 %v1807_v45, %v1613_v46  ;;  %v1924_v26 = vpop.permute.xlu0 %1923 }
 0x239   :  { %v2062_v43 = vadd.f32 %v2061_v23, %v2060_v58  ;;  %v2640_v7 = vpop.f32.mrf.mxu1  ;;  %v2045_v38 = vmul.f32 %v3469_v35, %v1949_v54 }
 0x23a   :  { %v2044_v10 = vmul.f32 %v3467_v60, %v1948_v31  ;;  %v1823_v40 = vadd.f32 %v2676_v33, %v2640_v7  ;;  %v1951_v13 = vmax.f32 %v1935_v32, 0.0  ;;  %v1934_v41 = vadd.f32 %v3465_v1, %v1808_v20  ;;  %v2021_v24 = vpop.permute.xlu1 %2020 }
 0x23b   :  { %v2064_v34 = vadd.f32 %v2063_v59, %v2062_v43  ;;  %v1623_v42 = vpop.f32.mrf.mxu1  ;;  %v2067_v15 = vsel %vm275_vm0, %v2045_v38, 0.0 }
 0x23c   :  { %v2065_v19 = vsel %vm275_vm0, %v2044_v10, 0.0  ;;  %v1937_v44 = vadd.f32 %v1904_v8, %v1823_v40  ;;  %v1818_v45 = vadd.f32 %v1817_v16, %v1623_v42  ;;  %v1950_v56 = vmax.f32 %v1934_v41, 0.0  ;;  %v2031_v32 = vpop.permute.xlu0 %2030 }
 0x23d   :  { %v2066_v28 = vadd.f32 %v2065_v19, %v2064_v34  ;;  %v2643_v5 = vpop.f32.mrf.mxu1  ;;  %v2047_v30 = vmul.f32 %v3475_v47, %v1951_v13 }
 0x23e   :  { %v1936_v35 = vadd.f32 %v3471_v25, %v1818_v45  ;;  %v1833_v60 = vadd.f32 %v2679_v36, %v2643_v5  ;;  %v2046_v63 = vmul.f32 %v3473_v27, %v1950_v56  ;;  %v1953_v1 = vmax.f32 %v1937_v44, 0.0  ;;  %v2026_v2 = vpop.permute.xlu1 %2025 }
 0x23f   :  { %v2068_v0 = vadd.f32 %v2067_v15, %v2066_v28  ;;  %v1633_v14 = vpop.f32.mrf.mxu1  ;;  %v2071_v25 = vsel %vm275_vm0, %v2047_v30, 0.0 }
 0x240   :  { %v1952_v22 = vmax.f32 %v1936_v35, 0.0  ;;  %v1828_v8 = vadd.f32 %v1827_v4, %v1633_v14  ;;  %v2069_v33 = vsel %vm275_vm0, %v2046_v63, 0.0  ;;  %v1939_v50 = vadd.f32 %v1914_v37, %v1833_v60  ;;  %v2094_v44 = vpop.permute.xlu0 %2093 }
 0x241   :  { %v2646_v48 = vpop.f32.mrf.mxu1  ;;  %v2070_v49 = vadd.f32 %v2069_v33, %v2068_v0  ;;  %v2049_v52 = vmul.f32 %v2016_v6, %v1953_v1 }
 0x242   :  { %v2048_v51 = vmul.f32 %v2011_v53, %v1952_v22  ;;  %v1938_v18 = vadd.f32 %v1909_v55, %v1828_v8  ;;  %v1955_v9 = vmax.f32 %v1939_v50, 0.0  ;;  %v2036_v43 = vpop.permute.xlu1 %2035 }
 0x243   :  { %v1643_v47 = vpop.f32.mrf.mxu1  ;;  %v2072_v12 = vadd.f32 %v2071_v25, %v2070_v49  ;;  %v2075_v11 = vsel %vm275_vm0, %v2049_v52, 0.0 }
 0x244   :  { %v2073_v27 = vsel %vm275_vm0, %v2048_v51, 0.0  ;;  %v1954_v62 = vmax.f32 %v1938_v18, 0.0  ;;  %v2051_v61 = vmul.f32 %v2026_v2, %v1955_v9 }
 0x245   :  { %v2682_v3 = vpop.f32.mrf.mxu1  ;;  %v2074_v21 = vadd.f32 %v2073_v27, %v2072_v12 }
 0x246   :  { %v1843_v57 = vadd.f32 %v2682_v3, %v2646_v48  ;;  %v2050_v16 = vmul.f32 %v2021_v24, %v1954_v62  ;;  %v2079_v20 = vsel %vm275_vm0, %v2051_v61, 0.0 }
 0x247   :  { %v1837_v53 = vpop.f32.mrf.mxu1  ;;  %v2076_v29 = vadd.f32 %v2075_v11, %v2074_v21 }
 0x248   :  { %v1941_v54 = vadd.f32 %v1924_v26, %v1843_v57  ;;  %v1838_v17 = vadd.f32 %v1837_v53, %v1643_v47  ;;  %v2077_v55 = vsel %vm275_vm0, %v2050_v16, 0.0 }
 0x249   :  { %v2078_v23 = vadd.f32 %v2077_v55, %v2076_v29 }
 0x24a   :  { %v1957_v58 = vmax.f32 %v1941_v54, 0.0  ;;  %v1940_v46 = vadd.f32 %v1919_v39, %v1838_v17 }
 0x24b   :  { %v2080_v37 = vadd.f32 %v2079_v20, %v2078_v23 }
 0x24c   :  { %v1956_v31 = vmax.f32 %v1940_v46, 0.0  ;;  %v2053_v7 = vmul.f32 %v2036_v43, %v1957_v58 }
 0x24e   :  { %v2052_v36 = vmul.f32 %v2031_v32, %v1956_v31  ;;  %v2083_v10 = vsel %vm275_vm0, %v2053_v7, 0.0 }
 0x250   :  { %v2081_v59 = vsel %vm275_vm0, %v2052_v36, 0.0 }
 0x251   :  { %v2082_v38 = vadd.f32 %v2081_v59, %v2080_v37 }
 0x253   :  { %v2084_v40 = vadd.f32 %v2083_v10, %v2082_v38 }
 0x255   :  { %v2085_v6 = vrot.slane %v2084_v40, 4 }
 0x257   :  { %v2086_v34 = vadd.f32 %v2085_v6, %v2084_v40 }
 0x259   :  { %v2087_v13 = vrot.slane %v2086_v34, 2 }
 0x25b   :  { %v2088_v41 = vadd.f32 %v2087_v13, %v2086_v34 }
 0x25d   :  { %v2089_v42 = vrot.slane %v2088_v41, 1 }
 0x25f   :  { %v2090_v19 = vadd.f32 %v2089_v42, %v2088_v41 }
 0x261   :  { %v2096_v45 = vadd.f32 %v2094_v44, %v2090_v19 }
 0x263   :  { %2098 = vst.msk [vmem:[#allocation5] sm:$0x1] %vm2097_vm9, %v2096_v45 }
 0x264   :  { %2768 = shalt.err (!%p2765_p9)
}
 0x265   :  { %2108 = dma.vmem_to_hbm [thread:$0]  %s2106_s27, 16, %s3507_s3, [#allocation4]  }
 0x266   :  { %2779 = dma.done.wait [#allocation4], 16  }
 0x267   :  { %2780 = vsyncadd [#allocation4], 4294967280 }
 0x268   :  { %2112 = vsyncpa [#allocation3], 1 }
 0x269   :  { %2113 = vsyncpa [#allocation4], 1 }

</bundles_post_ra>
